<compile_context>
chip_gen: v7x
topology: tpu7x:2x2x1
jax: 0.10.0
libtpu: 0.0.40
codegen_flags: <defaults>
</compile_context>

<pallas_src>
import functools

import jax
import jax.numpy as jnp
from jax.experimental import pallas as pl
from jax.experimental.pallas import tpu as pltpu

FEAT_CH = 2560      # EfficientNet-b7 extract_features output channels
STEM_K = 3          # 3x3 conv
STEM_STRIDE = 2
STEM_PAD = 1
LANES = 128


def _round_up(x, m):
    return ((x + m - 1) // m) * m


def _tpu_generation():
    try:
        kind = jax.devices()[0].device_kind.lower().replace(" ", "").replace("_", "")
    except Exception:
        return "v6e"
    if "v5lite" in kind or "v5e" in kind:
        return "v5e"
    if "7" in kind:
        return "v7x"
    return "v6e"


# generation -> row tile, channel tile, swish compute dtype, scoped VMEM bytes
_GEN_CONFIG = {
    "v5e": dict(tp=1024, ct=128, compute_dtype=jnp.float32, vmem_limit=64 << 20),
    "v6e": dict(tp=2048, ct=512, compute_dtype=jnp.bfloat16, vmem_limit=80 << 20),
    "v7x": dict(tp=2048, ct=512, compute_dtype=jnp.bfloat16, vmem_limit=48 << 20),
}

_GEN = _tpu_generation()


# ----------------------------------------------------------------------------
# Fused conv-stem + head partial reduction.
#   patches: (tp, K)  bf16   K = round_up(kh*kw*Cin, 8)
#   stem_w : (K, ct)  bf16
#   stem_b : (1, ct)  f32
#   cls_w  : (1, ct)  f32
#   out    : (tp, 1)  f32    out[r] = sum_c swish(conv)[r, c] * cls_w[c]
#   acc    : (tp, 128) f32 scratch, resident across the channel axis.
# ----------------------------------------------------------------------------
def _fused_stem_head_kernel(p_ref, w_ref, b_ref, cw_ref, o_ref, acc_ref, *,
                            nblk, compute_dtype):
    j = pl.program_id(1)

    @pl.when(j == 0)
    def _():
        acc_ref[...] = jnp.zeros_like(acc_ref)

    # Conv taps on the MXU, f32 accumulation.
    x = jnp.dot(p_ref[...], w_ref[...], preferred_element_type=jnp.float32)
    x = x + b_ref[...]                                       # bias, f32 VPU

    # swish = x * sigmoid(x): exp in compute_dtype (bf16 on v6e/v7x, f32 on
    # v5e), denominator reciprocal via approx EUP vrcp in f32.
    xs = x.astype(compute_dtype)
    denom = jnp.exp(-xs).astype(jnp.float32) + 1.0
    sw = x * pl.reciprocal(denom, approx=True)

    prod = sw * cw_ref[...]                                  # weight by cls_w, f32

    # Lane-dense partial sum: fold ct/128 lane groups with plain VALU adds
    # (static, vreg-aligned slices -> no data movement).
    ps = prod[:, 0:LANES]
    for blk in range(1, nblk):
        ps = ps + prod[:, blk * LANES:(blk + 1) * LANES]
    acc_ref[...] += ps

    # Single cross-lane (XLU) reduce + 1-lane store per row tile, last step only.
    @pl.when(j == pl.num_programs(1) - 1)
    def _():
        o_ref[...] = jnp.sum(acc_ref[...], axis=1, keepdims=True)


def fused_stem_head_partial(patches_bf16, stem_w_bf16, stem_b, cls_w_row, *,
                            gen=None):
    gen = gen or _GEN
    cfg = _GEN_CONFIG[gen]
    tp, ct, compute_dtype = cfg["tp"], cfg["ct"], cfg["compute_dtype"]

    P, K = patches_bf16.shape
    C = stem_w_bf16.shape[1]
    assert C % ct == 0, (C, ct)
    assert ct % LANES == 0, ct

    # Row tile: never exceed the (8-rounded) problem size; on v7x make sure
    # the "parallel" row axis has >= 2 tiles so both TensorCores get work.
    tp = min(tp, _round_up(P, 8))
    if gen == "v7x":
        tp = min(tp, max(8, _round_up(-(-P // 2), 8)))
    P_pad = _round_up(P, tp)
    if P_pad != P:
        # Padded rows produce swish(bias)*cls_w garbage; sliced off below.
        patches_bf16 = jnp.pad(patches_bf16, ((0, P_pad - P), (0, 0)))

    kernel = functools.partial(_fused_stem_head_kernel,
                               nblk=ct // LANES, compute_dtype=compute_dtype)

    out = pl.pallas_call(
        kernel,
        out_shape=jax.ShapeDtypeStruct((P_pad, 1), jnp.float32),
        grid=(P_pad // tp, C // ct),          # channel (reduction) axis innermost
        in_specs=[
            pl.BlockSpec((tp, K), lambda i, j: (i, 0)),   # patches (bf16)
            pl.BlockSpec((K, ct), lambda i, j: (0, j)),   # stem_w  (bf16)
            pl.BlockSpec((1, ct), lambda i, j: (0, j)),   # stem_b  (f32)
            pl.BlockSpec((1, ct), lambda i, j: (0, j)),   # cls_w   (f32)
        ],
        out_specs=pl.BlockSpec((tp, 1), lambda i, j: (i, 0)),
        scratch_shapes=[pltpu.VMEM((tp, LANES), jnp.float32)],
        compiler_params=pltpu.CompilerParams(
            dimension_semantics=("parallel", "arbitrary"),
            vmem_limit_bytes=cfg["vmem_limit"]),
    )(patches_bf16, stem_w_bf16, stem_b, cls_w_row)
    return out[:P]                                        # (P, 1) f32


# ----------------------------------------------------------------------------
# Glue: NCHW -> NHWC (bf16), padding, im2col patch extraction (plain JAX).
# ----------------------------------------------------------------------------
def _im2col_nhwc(x_nhwc, kh, kw, stride, pad):
    x = jnp.pad(x_nhwc, ((0, 0), (pad, pad), (pad, pad), (0, 0)))
    B, H, W, C = x.shape
    Hout = (H - kh) // stride + 1
    Wout = (W - kw) // stride + 1
    pieces = []
    for i in range(kh):
        for j in range(kw):
            pieces.append(x[:, i:i + Hout * stride:stride,
                            j:j + Wout * stride:stride, :])
    patches = jnp.concatenate(pieces, axis=-1)        # (B, Hout, Wout, kh*kw*C)
    return patches.reshape(B * Hout * Wout, kh * kw * C), Hout, Wout


# ----------------------------------------------------------------------------
# G2EffNet parameters + forward
# ----------------------------------------------------------------------------
def init_params(key, in_channels):
    k1, k2, k3 = jax.random.split(key, 3)
    kdim = STEM_K * STEM_K * in_channels
    kdim_pad = _round_up(kdim, 8)
    stem_w = jax.random.normal(k1, (kdim, FEAT_CH), jnp.float32) * (kdim ** -0.5)
    stem_w = jnp.pad(stem_w, ((0, kdim_pad - kdim), (0, 0)))   # zero-pad K -> mult of 8
    stem_b = jnp.zeros((1, FEAT_CH), jnp.float32)
    # nn.Linear(2560, 1): uniform(-1/sqrt(2560), 1/sqrt(2560))
    bound = FEAT_CH ** -0.5
    cls_w = jax.random.uniform(k2, (1, FEAT_CH), jnp.float32, -bound, bound)
    cls_b = jax.random.uniform(k3, (1, 1), jnp.float32, -bound, bound)
    return {"stem_w": stem_w, "stem_b": stem_b, "cls_w": cls_w, "cls_b": cls_b}


@jax.jit
def g2effnet_forward(params, spectrogram_nchw, features):
    # `features` is accepted but unused, exactly like the PyTorch forward.
    del features
    # Cast to bf16 BEFORE im2col: halves slice/concat and patch HBM traffic.
    x = jnp.transpose(spectrogram_nchw, (0, 2, 3, 1)).astype(jnp.bfloat16)  # NHWC
    B = x.shape[0]
    # TODO(synk): for very large spectrograms the im2col could move inside the
    # kernel (NHWC row-band BlockSpecs + 9 shifted slices) to avoid
    # materializing the 9x-expanded patch array in HBM.
    patches, Hf, Wf = _im2col_nhwc(x, STEM_K, STEM_K, STEM_STRIDE, STEM_PAD)
    S = Hf * Wf
    K_pad = params["stem_w"].shape[0]
    if K_pad != patches.shape[1]:
        patches = jnp.pad(patches, ((0, 0), (0, K_pad - patches.shape[1])))

    partial = fused_stem_head_partial(
        patches,                                    # bf16
        params["stem_w"].astype(jnp.bfloat16),
        params["stem_b"],
        params["cls_w"],
    )                                               # (B*S, 1) f32

    # Head finalize: mean over true S, + bias, sigmoid.  Tiny (B, S) array,
    # not worth a second pallas_call launch.
    pooled = jnp.mean(partial.reshape(B, S), axis=1, keepdims=True)
    return jax.nn.sigmoid(pooled + params["cls_b"])  # (B, 1)


if __name__ == "__main__":
    key = jax.random.PRNGKey(0)
    k_in, k_feat, k_params = jax.random.split(key, 3)

    B, C, H, W = 2, 3, 16, 16
    spectrograms = jax.random.normal(k_in, (B, C, H, W), jnp.float32)
    tab_features = jax.random.normal(k_feat, (B, 4), jnp.float32)  # unused in forward

    params = init_params(k_params, C)

    out = g2effnet_forward(params, spectrograms, tab_features)
    out = jax.block_until_ready(out)
    assert out.shape == (B, 1)
    assert bool(jnp.all((out >= 0.0) & (out <= 1.0)))
    print("KERNEL_OK")
</pallas_src>

<mosaic_0001>
module attributes {stable_mosaic.version = 11 : i64} {
  func.func @_fused_stem_head_kernel(%arg0: i32, %arg1: i32, %arg2: memref<128x32xbf16, #tpu.memory_space<vmem>>, %arg3: memref<32x512xbf16, #tpu.memory_space<vmem>>, %arg4: memref<1x512xf32, #tpu.memory_space<vmem>>, %arg5: memref<1x512xf32, #tpu.memory_space<vmem>>, %arg6: memref<128x1xf32, #tpu.memory_space<vmem>>, %arg7: memref<128x128xf32, #tpu.memory_space<vmem>>) attributes {dimension_semantics = [#tpu.dimension_semantics<parallel>, #tpu.dimension_semantics<arbitrary>], iteration_bounds = array<i64: 1, 5>, scalar_prefetch = 0 : i64, scratch_operands = 1 : i64, tpu.core_type = #tpu.core_type<tc>, window_params = [{transform_indices = @transform_0, window_bounds = array<i64: 128, 32>}, {transform_indices = @transform_1, window_bounds = array<i64: 32, 512>}, {transform_indices = @transform_2, window_bounds = array<i64: 1, 512>}, {transform_indices = @transform_3, window_bounds = array<i64: 1, 512>}, {transform_indices = @transform_4, window_bounds = array<i64: 128, 1>}]} {
    %c0_i32 = arith.constant 0 : i32
    %0 = arith.cmpi eq, %arg1, %c0_i32 : i32
    %1 = arith.extui %0 : i1 to i32
    %c0_i32_0 = arith.constant 0 : i32
    %2 = arith.cmpi ne, %1, %c0_i32_0 : i32
    scf.if %2 {
      %cst_15 = arith.constant 0.000000e+00 : f32
      %34 = vector.broadcast %cst_15 : f32 to vector<128x128xf32>
      %c0_16 = arith.constant 0 : index
      %c0_17 = arith.constant 0 : index
      %35 = vector.load %arg7[%c0_16, %c0_17] : memref<128x128xf32, #tpu.memory_space<vmem>>, vector<128x128xf32>
      tpu.vector_store %arg7[%c0_16, %c0_17], %34 {strides = array<i32>} : memref<128x128xf32, #tpu.memory_space<vmem>>, vector<128x128xf32>,
    } else {
    }
    %c0 = arith.constant 0 : index
    %c0_1 = arith.constant 0 : index
    %3 = vector.load %arg2[%c0, %c0_1] : memref<128x32xbf16, #tpu.memory_space<vmem>>, vector<128x32xbf16>
    %c0_2 = arith.constant 0 : index
    %c0_3 = arith.constant 0 : index
    %4 = vector.load %arg3[%c0_2, %c0_3] : memref<32x512xbf16, #tpu.memory_space<vmem>>, vector<32x512xbf16>
    %cst = arith.constant dense<0.000000e+00> : vector<128x512xf32>
    %5 = tpu.matmul %3, %4, %cst {dimension_numbers = #tpu.dot_dimension_numbers<[1], [0], [0], [1], [0, 0, 1, 1], [], []>} : vector<128x32xbf16>, vector<32x512xbf16>, vector<128x512xf32> -> vector<128x512xf32>
    %c0_4 = arith.constant 0 : index
    %c0_5 = arith.constant 0 : index
    %6 = vector.load %arg4[%c0_4, %c0_5] : memref<1x512xf32, #tpu.memory_space<vmem>>, vector<1x512xf32>
    %7 = vector.broadcast %6 : vector<1x512xf32> to vector<128x512xf32>
    %8 = arith.addf %5, %7 : vector<128x512xf32>
    %9 = arith.truncf %8 : vector<128x512xf32> to vector<128x512xbf16>
    %cst_6 = arith.constant 0.000000e+00 : bf16
    %10 = vector.broadcast %cst_6 : bf16 to vector<128x512xbf16>
    %11 = arith.subf %10, %9 : vector<128x512xbf16>
    %12 = math.exp %11 : vector<128x512xbf16>
    %13 = arith.extf %12 : vector<128x512xbf16> to vector<128x512xf32>
    %cst_7 = arith.constant 1.000000e+00 : f32
    %14 = vector.broadcast %cst_7 : f32 to vector<128x512xf32>
    %15 = arith.addf %13, %14 : vector<128x512xf32>
    %16 = tpu.reciprocal %15 {approx = true} : vector<128x512xf32> -> vector<128x512xf32>
    %17 = arith.mulf %8, %16 : vector<128x512xf32>
    %c0_8 = arith.constant 0 : index
    %c0_9 = arith.constant 0 : index
    %18 = vector.load %arg5[%c0_8, %c0_9] : memref<1x512xf32, #tpu.memory_space<vmem>>, vector<1x512xf32>
    %19 = vector.broadcast %18 : vector<1x512xf32> to vector<128x512xf32>
    %20 = arith.mulf %17, %19 : vector<128x512xf32>
    %21 = vector.extract_strided_slice %20 {offsets = [0, 0], sizes = [128, 128], strides = [1, 1]} : vector<128x512xf32> to vector<128x128xf32>
    %22 = vector.extract_strided_slice %20 {offsets = [0, 128], sizes = [128, 128], strides = [1, 1]} : vector<128x512xf32> to vector<128x128xf32>
    %23 = arith.addf %21, %22 : vector<128x128xf32>
    %24 = vector.extract_strided_slice %20 {offsets = [0, 256], sizes = [128, 128], strides = [1, 1]} : vector<128x512xf32> to vector<128x128xf32>
    %25 = arith.addf %23, %24 : vector<128x128xf32>
    %26 = vector.extract_strided_slice %20 {offsets = [0, 384], sizes = [128, 128], strides = [1, 1]} : vector<128x512xf32> to vector<128x128xf32>
    %27 = arith.addf %25, %26 : vector<128x128xf32>
    %c0_10 = arith.constant 0 : index
    %c0_11 = arith.constant 0 : index
    %28 = vector.load %arg7[%c0_10, %c0_11] : memref<128x128xf32, #tpu.memory_space<vmem>>, vector<128x128xf32>
    %29 = arith.addf %28, %27 : vector<128x128xf32>
    %c0_12 = arith.constant 0 : index
    %c0_13 = arith.constant 0 : index
    %30 = vector.load %arg7[%c0_12, %c0_13] : memref<128x128xf32, #tpu.memory_space<vmem>>, vector<128x128xf32>
    tpu.vector_store %arg7[%c0_12, %c0_13], %29 {strides = array<i32>} : memref<128x128xf32, #tpu.memory_space<vmem>>, vector<128x128xf32>,
    %c4_i32 = arith.constant 4 : i32
    %31 = arith.cmpi eq, %arg1, %c4_i32 : i32
    %32 = arith.extui %31 : i1 to i32
    %c0_i32_14 = arith.constant 0 : i32
    %33 = arith.cmpi ne, %32, %c0_i32_14 : i32
    scf.if %33 {
      %c0_15 = arith.constant 0 : index
      %c0_16 = arith.constant 0 : index
      %34 = vector.load %arg7[%c0_15, %c0_16] : memref<128x128xf32, #tpu.memory_space<vmem>>, vector<128x128xf32>
      %cst_17 = arith.constant dense<0.000000e+00> : vector<128xf32>
      %35 = vector.multi_reduction <add>, %34, %cst_17 [1] : vector<128x128xf32> to vector<128xf32>
      %36 = vector.shape_cast %35 : vector<128xf32> to vector<128x1xf32>
      %c0_18 = arith.constant 0 : index
      %c0_19 = arith.constant 0 : index
      %37 = vector.load %arg6[%c0_18, %c0_19] : memref<128x1xf32, #tpu.memory_space<vmem>>, vector<128x1xf32>
      tpu.vector_store %arg6[%c0_18, %c0_19], %36 {strides = array<i32>} : memref<128x1xf32, #tpu.memory_space<vmem>>, vector<128x1xf32>,
    } else {
    }
    return
  }
  func.func @transform_0(%arg0: i32, %arg1: i32) -> (i32, i32) {
    %c0_i32 = arith.constant 0 : i32
    %c0_i32_0 = arith.constant 0 : i32
    return %arg0, %c0_i32 : i32, i32
  }
  func.func @transform_1(%arg0: i32, %arg1: i32) -> (i32, i32) {
    %c0_i32 = arith.constant 0 : i32
    %c0_i32_0 = arith.constant 0 : i32
    return %c0_i32, %arg1 : i32, i32
  }
  func.func @transform_2(%arg0: i32, %arg1: i32) -> (i32, i32) {
    %c0_i32 = arith.constant 0 : i32
    %c0_i32_0 = arith.constant 0 : i32
    return %c0_i32, %arg1 : i32, i32
  }
  func.func @transform_3(%arg0: i32, %arg1: i32) -> (i32, i32) {
    %c0_i32 = arith.constant 0 : i32
    %c0_i32_0 = arith.constant 0 : i32
    return %c0_i32, %arg1 : i32, i32
  }
  func.func @transform_4(%arg0: i32, %arg1: i32) -> (i32, i32) {
    %c0_i32 = arith.constant 0 : i32
    %c0_i32_0 = arith.constant 0 : i32
    return %arg0, %c0_i32 : i32, i32
  }
}

</mosaic_0001>

<bundles_post_ra>
// kernel: g2effnet_forward.1
= control target key start
LH: loop header
LB: loop body
LE: loop exit
PB: predicated region body
PF: predicated region fallthrough
CT: control target
= control target key end

     0   :  { %s2979_s0 = inlined_call_operand.hbm [shape: bf16[128,32], index: 0, kind: input, shape index: {}]   ;;  %s2980_s1 = inlined_call_operand.hbm [shape: bf16[32,2560], index: 1, kind: input, shape index: {}]   ;;  %s2981_s2 = inlined_call_operand.hbm [shape: f32[1,2560], index: 2, kind: input, shape index: {}]   ;;  %s2982_s3 = inlined_call_operand.hbm [shape: f32[1,2560], index: 3, kind: input, shape index: {}]   ;;  %s2983_s4 = inlined_call_operand.hbm [shape: f32[128,1], index: 4, kind: output, shape index: {}]  }
   0x1   :  { %3005 = sst [smem:[#allocation36_spill]] %s2980_s1 }
   0x2   :  { %9 = vsyncpa [#allocation4], 0 }
   0x3   :  { %10 = vsyncpa [#allocation7], 0 }
   0x4   :  { %12 = vsyncpa [#allocation7 + $0x1], 0 }
   0x5   :  { %13 = vsyncpa [#allocation10], 0 }
   0x6   :  { %15 = vsyncpa [#allocation10 + $0x1], 0 }
   0x7   :  { %16 = vsyncpa [#allocation5], 0  ;;  %s2127_s15 = smov 0   ;;  %s2129_s16 = smov 0  }
   0x8   :  { %s2131_s17 = smov 0   ;;  %s2133_s18 = smov 0  }
   0x9   :  { %s2135_s19 = smov 0   ;;  %s2137_s20 = smov 0  }
   0xa LB: > { %s31_s21 = sadd.s32 1, %s2082_s19  ;;  %s67_s22 = sadd.s32 1, %s2074_s17  ;;  %s2086_s20 = sphi %s2137_s20, %s22_s20   ;;  %s2082_s19 = sphi %s2135_s19, %s3069_s19   ;;  %s2078_s18 = sphi %s2133_s18, %s3068_s18   ;;  %s2074_s17 = sphi %s2131_s17, %s3067_s17   ;;  %s2070_s16 = sphi %s2129_s16, %s3066_s16   ;;  %s2066_s15 = sphi %s2127_s15, %s3065_s15  }
   0xb   : > { %p32_p0 = scmp.ge.s32.totalorder %s31_s21, 5  ;;  %p74_p1 = scmp.ne.s32.totalorder %s2074_s17, %s2070_s16 }
   0xc   : > { %p75_p2 = scmp.eq.s32.totalorder %s2086_s20, 0  ;;  %p1605_p4 = scmp.lt.s32.totalorder %s2086_s20, 5 }
   0xd   : > { %s3071_s21 = smov (%p32_p0, %s31_s21), 0  ;;  %s198_s24 = sand.u32 1, %s2086_s20  }
   0xe   : > { %3006 = sst [smem:[#allocation16_spill]] %s3071_s21  ;;  %p76_p3 = por %p75_p2, %p74_p1 }
   0xf   : > { %s64_s23 = ssub.s32 %s2082_s19, %s3071_s21  ;;  %s2169_s25 = sand.u32 1, %s2074_s17  }
  0x10   : > { %p65_p5 = scmp.eq.s32.totalorder %s64_s23, 0  ;;  %s1573_s26 = sshll.u32 %s2082_s19, 8 }
  0x11   : > { %s1521_s28 = sshll.u32 %s2169_s25, 6  ;;  %s3007_s1 = sld [smem:[#allocation36_spill]] }
  0x12   : > { %s2173_s27 = scalar_select %p65_p5, %s2074_s17, %s67_s22  }
  0x13   : > { %p2181_p6 = pnand %p1605_p4, %p76_p3  ;;  %s202_s7 = scalar_lea.vmem [#allocation6], %s1521_s28 }
  0x14   : > { %s209_s8 = sshll.u32 %s202_s7, 4  ;;  %s2187_s9 = scalar_lea.sflag [#allocation7], %s198_s24  ;;  %s2185_s8 = int_to_ptr.vmem [resolvable:$true] %s209_s8 }
  0x15   : > { %s3008_s6 = scalar_select %p2181_p6, 1, 0 }
  0x16   : > { %p2193_p8 = pneg %p2181_p6 }
  0x17   : > { %s2179_s5 = scalar_lea.hbm %s3007_s1, %s1573_s26  ;;  %s1885_s14 = scalar_lea.hbm %s3007_s1, 5120 }
  0x18   : > { %s1880_s10 = scalar_lea.hbm %s2179_s5, 1024  ;;  %p1886_p11 = scmp.lt.u32.totalorder %s2179_s5, %s3007_s1 }
  0x19   : > { %p1881_p7 = scmp.ne.s32.totalorder %s2179_s5, %s1880_s10  ;;  %p1887_p12 = scmp.lt.u32.totalorder %s1885_s14, %s1880_s10 }
  0x1a   : > { %s3009_s11 = scalar_select %p2193_p8, 1, 0 }
  0x1b   : > { %p1883_p9 = pnand %p2193_p8, %p1881_p7  ;;  %p1888_p13 = por %p1887_p12, %p1886_p11 }
  0x1c   : > { %p1889_p0 = scmp.lt.u32.totalorder %s1880_s10, %s2179_s5 }
  0x1d   : > { %p1884_p10 = pneg %p1883_p9 }
  0x1e   : > { %p1890_p1 = por %p1889_p0, %p1888_p13 }
  0x20   : > { %p1891_p2 = pnand %p1890_p1, %p1884_p10 }
  0x22   : > { %1894 = shalt.err (!%p1891_p2)
}
  0x23   : > { %s1895_s24 = scalar_lea.vmem %s2185_s8, 1024  ;;  %s2088_s26 = smov [#allocation6]  }
  0x24   : > { %p1896_p3 = scmp.ne.s32.totalorder %s2185_s8, %s1895_s24  ;;  %s1900_s28 = sshll.u32 %s2088_s26, 4  ;;  %s1901_s28 = int_to_ptr.vmem [resolvable:$false] %s1900_s28 }
  0x25   : > { %s1902_s29 = scalar_lea.vmem %s1901_s28, 2048  ;;  %p1903_p7 = scmp.lt.s32.totalorder %s2185_s8, %s1901_s28 }
  0x26   : > { %p1898_p4 = pnand %p1896_p3, %p2193_p8  ;;  %p1904_p9 = scmp.lt.s32.totalorder %s1902_s29, %s1895_s24 }
  0x28   : > { %p1899_p5 = pneg %p1898_p4  ;;  %p1905_p11 = por %p1904_p9, %p1903_p7 }
  0x2a   : > { %p1906_p12 = pnand %p1905_p11, %p1899_p5 }
  0x2c   : > { %1909 = shalt.err (!%p1906_p12)
}
  0x2d   : > { %s2089_s30 = smov 1280   ;;  %s2090_s7 = smov 256  }
  0x2e   : > { %s2091_s10 = smov 16   ;;  %s2218_s12 = sadd.s32 4294967295, %s2086_s20  }
  0x2f   : > { %1597 = dma.hbm_to_vmem [thread:$0]  (!%p2181_p6), %s2179_s5, 1024, %s2185_s8, %s2187_s9, %s2089_s30, %s2090_s7, %s2091_s10  }
  0x30   : > { %p80_p10 = scmp.ne.s32.totalorder %s2070_s16, %s2066_s15  ;;  %p2985_p13 = scmp.eq.s32.totalorder %s2218_s12, 0 }
  0x31   : > { %p1518_p0 = scmp.ge.s32.totalorder %s2086_s20, 1  ;;  %p169_p1 = scmp.lt.s32.totalorder %s2086_s20, 6 }
  0x32   : > { %p2227_p2 = por %p2985_p13, %p80_p10  ;;  %s2092_s5 = smov [#allocation3]  }
  0x33   : > { %p2231_p3 = pnand %p1518_p0, %p169_p1  ;;  %s184_s8 = sshll.u32 %s2092_s5, 4  ;;  %s2235_s8 = int_to_ptr.vmem [resolvable:$true] %s184_s8 }
  0x34   : > { %s3010_s13 = scalar_select %p2227_p2, 1, 0 }
  0x35   : > { %s3011_s14 = scalar_select %p2231_p3, 1, 0 }
  0x36   : > { %p1590_p4 = pneg %p2231_p3  ;;  %s2992_s15 = sshll.u32 %s2169_s25, 2 }
  0x37   : > { %s2993_s22 = sshll.u32 %s2082_s19, 6  ;;  %s223_s29 = scalar_lea.vmem [#allocation8], %s2992_s15 }
  0x38   : > { %p2243_p5 = pnand %p1590_p4, %p2985_p13  ;;  %s2252_s28 = scalar_lea.hbm %s2981_s2, %s2993_s22 }
  0x39   : > { %s231_s30 = sshll.u32 %s223_s29, 4  ;;  %s1910_s5 = scalar_lea.hbm %s2979_s0, 1024  ;;  %s2256_s30 = int_to_ptr.vmem [resolvable:$true] %s231_s30 }
  0x3a   : > { %p1911_p7 = scmp.ne.s32.totalorder %s2979_s0, %s1910_s5  ;;  %p1912_p9 = pneg %p2243_p5 }
  0x3b   : > { %p1917_p10 = scmp.lt.u32.totalorder %s1910_s5, %s2979_s0 }
  0x3c   : > { %p1913_p11 = pnand %p1912_p9, %p1911_p7 }
  0x3e   : > { %p1914_p12 = pneg %p1913_p11 }
  0x40   : > { %p1919_p0 = pnand %p1917_p10, %p1914_p12 }
  0x42   : > { %1922 = shalt.err (!%p1919_p0)
}
  0x43   : > { %s1923_s29 = scalar_lea.vmem %s2235_s8, 1024  ;;  %p1931_p2 = scmp.lt.s32.totalorder %s2235_s8, %s2235_s8 }
  0x44   : > { %p1924_p1 = scmp.ne.s32.totalorder %s2235_s8, %s1923_s29  ;;  %p1932_p3 = scmp.lt.s32.totalorder %s1923_s29, %s1923_s29 }
  0x46   : > { %p1926_p4 = pnand %p1924_p1, %p1912_p9  ;;  %p1933_p6 = por %p1932_p3, %p1931_p2 }
  0x48   : > { %p1927_p13 = pneg %p1926_p4 }
  0x4a   : > { %p1934_p8 = pnand %p1933_p6, %p1927_p13 }
  0x4c   : > { %1937 = shalt.err (!%p1934_p8)
}
  0x4d   : > { %s2093_s1 = smov 64   ;;  %s2094_s21 = smov 4  }
  0x4e   : > { %1593 = dma.hbm_to_vmem [thread:$0]  (!%p2243_p5), %s2979_s0, 1024, %s2235_s8, [#allocation4], %s2093_s1, %s2093_s1, %s2094_s21  }
  0x4f   : > { %s1938_s5 = scalar_lea.hbm %s2252_s28, 64  ;;  %p3013_p9 = scmp.ne.s32.totalorder %s3009_s11, 0 }
  0x50   : > { %p1939_p7 = scmp.ne.s32.totalorder %s2252_s28, %s1938_s5  ;;  %s1943_s29 = scalar_lea.hbm %s2981_s2, 320 }
  0x51   : > { %p1944_p8 = scmp.lt.u32.totalorder %s2252_s28, %s2981_s2  ;;  %p1945_p13 = scmp.lt.u32.totalorder %s1943_s29, %s1938_s5 }
  0x52   : > { %p1941_p2 = pnand %p1939_p7, %p3013_p9  ;;  %p1947_p11 = scmp.lt.u32.totalorder %s1938_s5, %s2252_s28 }
  0x53   : > { %p1946_p3 = por %p1945_p13, %p1944_p8 }
  0x54   : > { %p1942_p6 = pneg %p1941_p2 }
  0x55   : > { %p1948_p12 = por %p1947_p11, %p1946_p3 }
  0x57   : > { %p1949_p10 = pnand %p1948_p12, %p1942_p6 }
  0x59   : > { %1952 = shalt.err (!%p1949_p10)
}
  0x5a   : > { %s1953_s8 = scalar_lea.vmem %s2256_s30, 64  ;;  %s2095_s23 = smov [#allocation8]  }
  0x5b   : > { %p1954_p5 = scmp.ne.s32.totalorder %s2256_s30, %s1953_s8  ;;  %s1958_s1 = sshll.u32 %s2095_s23, 4  ;;  %s1959_s1 = int_to_ptr.vmem [resolvable:$false] %s1958_s1 }
  0x5c   : > { %s1960_s15 = scalar_lea.vmem %s1959_s1, 128  ;;  %p1961_p4 = scmp.lt.s32.totalorder %s2256_s30, %s1959_s1 }
  0x5d   : > { %p1956_p0 = pnand %p1954_p5, %p3013_p9  ;;  %p1962_p7 = scmp.lt.s32.totalorder %s1960_s15, %s1953_s8 }
  0x5f   : > { %p1957_p1 = pneg %p1956_p0  ;;  %p1963_p2 = por %p1962_p7, %p1961_p4 }
  0x61   : > { %p1964_p8 = pnand %p1963_p2, %p1957_p1 }
  0x63   : > { %1967 = shalt.err (!%p1964_p8)
}
  0x64   : > { %p3014_p6 = scmp.ne.s32.totalorder %s3008_s6, 0  ;;  %s3015_s22 = sshll.u32 %s2082_s19, 6 }
  0x65   : > { %s2306_s10 = scalar_lea.hbm %s2982_s3, %s3015_s22  ;;  %s3016_s5 = sshll.u32 %s2169_s25, 2 }
  0x66   : > { %1600 = dma.hbm_to_vmem [thread:$0]  (!%p3014_p6), %s2252_s28, 64, %s2256_s30, %s2187_s9  }
  0x67   : > { %s242_s24 = scalar_lea.vmem [#allocation9], %s3016_s5  ;;  %s239_s29 = scalar_lea.sflag [#allocation10], %s2169_s25 }
  0x68   : > { %s250_s26 = sshll.u32 %s242_s24, 4  ;;  %s1968_s8 = scalar_lea.hbm %s2306_s10, 64  ;;  %s251_s26 = int_to_ptr.vmem [resolvable:$true] %s250_s26 }
  0x69   : > { %p1969_p13 = scmp.ne.s32.totalorder %s2306_s10, %s1968_s8  ;;  %s1973_s30 = scalar_lea.hbm %s2982_s3, 320 }
  0x6a   : > { %p1974_p12 = scmp.lt.u32.totalorder %s2306_s10, %s2982_s3  ;;  %p1975_p10 = scmp.lt.u32.totalorder %s1973_s30, %s1968_s8 }
  0x6b   : > { %p1971_p3 = pnand %p1969_p13, %p3013_p9  ;;  %p1977_p0 = scmp.lt.u32.totalorder %s1968_s8, %s2306_s10 }
  0x6c   : > { %p1976_p5 = por %p1975_p10, %p1974_p12 }
  0x6d   : > { %p1972_p11 = pneg %p1971_p3 }
  0x6e   : > { %p1978_p1 = por %p1977_p0, %p1976_p5 }
  0x70   : > { %p1979_p4 = pnand %p1978_p1, %p1972_p11 }
  0x72   : > { %1982 = shalt.err (!%p1979_p4)
}
  0x73   : > { %s1983_s25 = scalar_lea.vmem %s251_s26, 64  ;;  %s2096_s15 = smov [#allocation9]  }
  0x74   : > { %p1984_p7 = scmp.ne.s32.totalorder %s251_s26, %s1983_s25  ;;  %s1988_s22 = sshll.u32 %s2096_s15, 4  ;;  %s1989_s22 = int_to_ptr.vmem [resolvable:$false] %s1988_s22 }
  0x75   : > { %s1990_s21 = scalar_lea.vmem %s1989_s22, 128  ;;  %p1991_p13 = scmp.lt.s32.totalorder %s251_s26, %s1989_s22 }
  0x76   : > { %p1986_p2 = pnand %p1984_p7, %p3013_p9  ;;  %p1992_p3 = scmp.lt.s32.totalorder %s1990_s21, %s1983_s25 }
  0x78   : > { %p1987_p8 = pneg %p1986_p2  ;;  %p1993_p6 = por %p1992_p3, %p1991_p13 }
  0x7a   : > { %p1994_p10 = pnand %p1993_p6, %p1987_p8 }
  0x7c   : > { %1997 = shalt.err (!%p1994_p10)
}
  0x7d   : > { %p3017_p12 = scmp.ne.s32.totalorder %s3008_s6, 0  ;;  %p3018_p11 = scmp.ne.s32.totalorder %s3011_s14, 0 }
  0x7f   : > { %1603 = dma.hbm_to_vmem [thread:$0]  (!%p3017_p12), %s2306_s10, 64, %s251_s26, %s239_s29  }
  0x80   : > { %259 = sbr.rel (%p3018_p11) target bundleno = 741 (0x2e5), region = 36 }
  0x87   : > { %p3019_p5 = scmp.eq.s32.totalorder %s2218_s12, 0 }
  0x89   : > { %2049 = dma.done.wait (%p3019_p5), [#allocation4], 1024   ;;  %p3020_p9 = pmov %p3019_p5 }
  0x8a   : > { %s265_s11 = sand.u32 1, %s2218_s12   ;;  %s267_s7 = sand.u32 1, %s2070_s16  }
  0x8b   : > { %2051 = vsyncadd (%p3020_p9), [#allocation4], 4294966272  ;;  %s1532_s5 = sshll.u32 %s267_s7, 6  ;;  %s266_s24 = scalar_lea.sflag [#allocation7], %s265_s11 }
  0x8c   : > { %s2336_s8 = scalar_lea.vmem [#allocation6], %s1532_s5  ;;  %p3021_p6 = scmp.ne.s32.totalorder %s3010_s13, 0 }
  0x8e   : > { %2053 = dma.done.wait (%p3021_p6), %s266_s24, 1088  }
  0x8f   : > { %2055 = vsyncadd (%p3021_p6), %s266_s24, 4294966208  ;;  %s1533_s6 = sshll.u32 %s267_s7, 2  ;;  %s284_s10 = scalar_lea.sflag [#allocation10], %s267_s7 }
  0x90   : > { %s2342_s14 = scalar_lea.vmem [#allocation8], %s1533_s6  ;;  %s2344_s26 = scalar_lea.vmem [#allocation9], %s1533_s6 }
  0x91   : > { %2057 = dma.done.wait (%p3021_p6), %s284_s10, 64  }
  0x92   : > { %2059 = vsyncadd (%p3021_p6), %s284_s10, 4294967232  ;;  %p1535_p0 = scmp.ne.s32.totalorder %s2078_s18, 0 }
  0x93   : > { %v2097_v0 = vmov (!%p1535_p0), 0.0  }
  0x94   : > { %326 = sbr.rel (%p1535_p0) target bundleno = 156 (0x9c), region = 56  ;;  %327 = vst [vmem:[#allocation2] sm:$0xff] (!%p1535_p0), %v2097_v0  ;;  %328 = vst [vmem:[#allocation2 + $0x8] sm:$0xff] (!%p1535_p0), %v2097_v0 }
  0x95   : > { %329 = vst [vmem:[#allocation2 + $0x10] sm:$0xff] (!%p1535_p0), %v2097_v0  ;;  %330 = vst [vmem:[#allocation2 + $0x18] sm:$0xff] (!%p1535_p0), %v2097_v0 }
  0x96   : > { %331 = vst [vmem:[#allocation2 + $0x20] sm:$0xff] (!%p1535_p0), %v2097_v0  ;;  %332 = vst [vmem:[#allocation2 + $0x28] sm:$0xff] (!%p1535_p0), %v2097_v0 }
  0x97   : > { %333 = vst [vmem:[#allocation2 + $0x30] sm:$0xff] (!%p1535_p0), %v2097_v0  ;;  %334 = vst [vmem:[#allocation2 + $0x38] sm:$0xff] (!%p1535_p0), %v2097_v0 }
  0x98   : > { %335 = vst [vmem:[#allocation2 + $0x40] sm:$0xff] (!%p1535_p0), %v2097_v0  ;;  %336 = vst [vmem:[#allocation2 + $0x48] sm:$0xff] (!%p1535_p0), %v2097_v0 }
  0x99   : > { %337 = vst [vmem:[#allocation2 + $0x50] sm:$0xff] (!%p1535_p0), %v2097_v0  ;;  %338 = vst [vmem:[#allocation2 + $0x58] sm:$0xff] (!%p1535_p0), %v2097_v0 }
  0x9a   : > { %339 = vst [vmem:[#allocation2 + $0x60] sm:$0xff] (!%p1535_p0), %v2097_v0  ;;  %340 = vst [vmem:[#allocation2 + $0x68] sm:$0xff] (!%p1535_p0), %v2097_v0 }
  0x9b   : > { %341 = vst [vmem:[#allocation2 + $0x70] sm:$0xff] %v2097_v0  ;;  %342 = vst [vmem:[#allocation2 + $0x78] sm:$0xff] %v2097_v0 }
  0x9c PF: > { %v1668_v1 = vld [vmem:[%s2336_s8 + $0x4] ss:$16 sps:$4 sm:$0xff]   ;;  %v1670_v2 = vld [vmem:[%s2336_s8 + $0xc] ss:$16 sps:$4 sm:$0xff]   ;;  %v2098_v3 = vmov 0   ;;  %vm469_vm0 = vcmask 261120   ;;  %v369_v18 = vlaneseq }
  0x9d   : > { %526 = vmatprep.mubr.bf16.mxu0 %v2098_v3  ;;  %639 = vmatprep.mubr.bf16.mxu1 %v2098_v3  ;;  %v1672_v4 = vld [vmem:[%s2336_s8] ss:$16 sps:$4 sm:$0xff]   ;;  %v1673_v5 = vld [vmem:[%s2336_s8 + $0x8] ss:$16 sps:$4 sm:$0xff]   ;;  %v1674_v6 = vld [vmem:[%s2336_s8 + $0x24] ss:$16 sps:$4 sm:$0xff]  }
  0x9e   : > { %494 = vmatprep.subr.bf16.mxu0 %v1668_v1  ;;  %607 = vmatprep.subr.bf16.mxu1 %v1670_v2  ;;  %v1676_v7 = vld [vmem:[%s2336_s8 + $0x2c] ss:$16 sps:$4 sm:$0xff]   ;;  %v1678_v8 = vld [vmem:[%s2336_s8 + $0x20] ss:$16 sps:$4 sm:$0xff]   ;;  %v1679_v9 = vld [vmem:[%s2336_s8 + $0x28] ss:$16 sps:$4 sm:$0xff]  }
  0x9f   : > { %495 = vmatpush1.bf16.msra.mxu0 %v1672_v4  ;;  %608 = vmatpush1.bf16.msra.mxu1 %v1673_v5  ;;  %v1680_v10 = vld [vmem:[#allocation3] sm:$0xff]   ;;  %v1681_v11 = vld [vmem:[#allocation3 + $0x8] sm:$0xff]   ;;  %v1682_v12 = vld [vmem:[#allocation3 + $0x10] sm:$0xff]   ;;  %v2375_v19 = vshrl.u32 %v369_v18, 7  ;;  %p1568_p1 = scmp.ne.s32.totalorder %s2078_s18, 4 }
  0xa0   : > { %496 = vmatprep.subr.bf16.mxu0 %v1674_v6  ;;  %609 = vmatprep.subr.bf16.mxu1 %v1676_v7  ;;  %v1683_v13 = vld [vmem:[#allocation3 + $0x18] sm:$0xff]   ;;  %v1684_v14 = vld [vmem:[#allocation3 + $0x20] sm:$0xff]   ;;  %v1685_v15 = vld [vmem:[#allocation3 + $0x28] sm:$0xff]   ;;  %vm1370_vm1 = vcmask (!%p1568_p1), 7168  }
  0xa1   : > { %v1686_v16 = vld [vmem:[#allocation3 + $0x30] sm:$0xff]   ;;  %v1687_v17 = vld [vmem:[#allocation3 + $0x38] sm:$0xff]   ;;  %v379_v20 = vsub.s32 2, %v2375_v19  ;;  %v383_v21 = vsub.s32 3, %v2375_v19  ;;  %v371_v22 = vsub.s32 0, %v2375_v19  ;;  %v375_v24 = vsub.s32 1, %v2375_v19 }
  0xa2   : > { %v367_v23 = vld [vmem:[%s2342_s14] sm:$0xf] }
  0xa3   : > { %497 = vmatpush1.bf16.msra.mxu0 %v1678_v8  ;;  %610 = vmatpush1.bf16.msra.mxu1 %v1679_v9  ;;  %v2384_v25 = vrot.slane %v367_v23, %v379_v20  ;;  %v2388_v26 = vrot.slane %v367_v23, %v383_v21  ;;  %v2392_v27 = vrot.slane %v367_v23, %v371_v22 }
  0xa4   : > { %v2396_v30 = vrot.slane %v367_v23, %v375_v24 }
  0xa6   : > { %1552 = vmatmul.mubr.msk.bf16.vlgmr.msra.gmra.mrb[0].mxu0 %vm469_vm0, %v1680_v10  ;;  %1560 = vmatmul.mubr.msk.bf16.vlgmr.msra.gmra.mrb[0].mxu1 %vm469_vm0, %v1680_v10 }
  0xa7   : > { %536 = vmatprep.mubr.bf16.mxu0 %v2098_v3  ;;  %649 = vmatprep.mubr.bf16.mxu1 %v2098_v3 }
  0xae   : > { %1553 = vmatmul.mubr.msk.bf16.gmra.mrb[4].mxu0 %vm469_vm0, %v1681_v11  ;;  %1561 = vmatmul.mubr.msk.bf16.gmra.mrb[4].mxu1 %vm469_vm0, %v1681_v11  ;;  %v1136_v11 = vld [vmem:[%s2344_s26] sm:$0xf] }
  0xaf   : > { %546 = vmatprep.mubr.bf16.mxu0 %v2098_v3  ;;  %659 = vmatprep.mubr.bf16.mxu1 %v2098_v3 }
  0xb6   : > { %1554 = vmatmul.mubr.msk.bf16.gmra.mrb[8].mxu0 %vm469_vm0, %v1682_v12  ;;  %1562 = vmatmul.mubr.msk.bf16.gmra.mrb[8].mxu1 %vm469_vm0, %v1682_v12 }
  0xb7   : > { %556 = vmatprep.mubr.bf16.mxu0 %v2098_v3  ;;  %669 = vmatprep.mubr.bf16.mxu1 %v2098_v3 }
  0xbe   : > { %1555 = vmatmul.mubr.msk.bf16.gmra.mrb[12].mxu0 %vm469_vm0, %v1683_v13  ;;  %1563 = vmatmul.mubr.msk.bf16.gmra.mrb[12].mxu1 %vm469_vm0, %v1683_v13 }
  0xbf   : > { %566 = vmatprep.mubr.bf16.mxu0 %v2098_v3  ;;  %679 = vmatprep.mubr.bf16.mxu1 %v2098_v3 }
  0xc6   : > { %1556 = vmatmul.mubr.msk.bf16.gmra.mrb[16].mxu0 %vm469_vm0, %v1684_v14  ;;  %1564 = vmatmul.mubr.msk.bf16.gmra.mrb[16].mxu1 %vm469_vm0, %v1684_v14 }
  0xc7   : > { %576 = vmatprep.mubr.bf16.mxu0 %v2098_v3  ;;  %689 = vmatprep.mubr.bf16.mxu1 %v2098_v3 }
  0xce   : > { %1557 = vmatmul.mubr.msk.bf16.gmra.mrb[20].mxu0 %vm469_vm0, %v1685_v15  ;;  %1565 = vmatmul.mubr.msk.bf16.gmra.mrb[20].mxu1 %vm469_vm0, %v1685_v15 }
  0xcf   : > { %586 = vmatprep.mubr.bf16.mxu0 %v2098_v3  ;;  %699 = vmatprep.mubr.bf16.mxu1 %v2098_v3 }
  0xd6   : > { %1558 = vmatmul.mubr.msk.bf16.gmra.mrb[24].mxu0 %vm469_vm0, %v1686_v16  ;;  %1566 = vmatmul.mubr.msk.bf16.gmra.mrb[24].mxu1 %vm469_vm0, %v1686_v16 }
  0xd7   : > { %596 = vmatprep.mubr.bf16.mxu0 %v2098_v3  ;;  %709 = vmatprep.mubr.bf16.mxu1 %v2098_v3 }
  0xde   : > { %1559 = vmatmul.mubr.msk.bf16.gmra.mrb[28].mxu0 %vm469_vm0, %v1687_v17  ;;  %1567 = vmatmul.mubr.msk.bf16.gmra.mrb[28].mxu1 %vm469_vm0, %v1687_v17 }
 0x179   : > { %v528_v28 = vpop.f32.mrb[0].mxu0  ;;  %v641_v29 = vpop.f32.mrb[0].mxu1 }
 0x17a   : > { %v2399_v31 = vadd.f32 %v641_v29, %v2384_v25  ;;  %v530_v32 = vpop.f32.mrb[1].mxu0  ;;  %v643_v33 = vpop.f32.mrb[1].mxu1  ;;  %v2405_v37 = vadd.f32 %v528_v28, %v2392_v27  ;;  %v2465_v28 = vrot.slane %v1136_v11, %v371_v22 }
 0x17b   : > { %v2402_v34 = vadd.f32 %v643_v33, %v2388_v26  ;;  %v532_v35 = vpop.f32.mrb[2].mxu0  ;;  %v645_v36 = vpop.f32.mrb[2].mxu1  ;;  %v2414_v42 = vadd.f32 %v530_v32, %v2396_v30 }
 0x17c   : > { %v2408_v38 = vadd.f32 %v532_v35, %v2392_v27  ;;  %v2411_v39 = vadd.f32 %v645_v36, %v2384_v25  ;;  %v534_v40 = vpop.f32.mrb[3].mxu0  ;;  %v647_v41 = vpop.f32.mrb[3].mxu1 }
 0x17d   : > { %v2417_v43 = vadd.f32 %v534_v40, %v2396_v30  ;;  %v2420_v44 = vadd.f32 %v647_v41, %v2388_v26  ;;  %v2472_v40 = vrot.slane %v1136_v11, %v379_v20 }
 0x17e   : > { %v720_v45 = vpack.c.bf16 %v2408_v38, %v2405_v37  ;;  %v722_v46 = vpack.c.bf16 %v2411_v39, %v2399_v31 }
 0x17f   : > { %v721_v47 = vpack.c.bf16 %v2417_v43, %v2414_v42  ;;  %v723_v48 = vpack.c.bf16 %v2420_v44, %v2402_v34 }
 0x180   : > { %v752_v49 = vsub.bf16 0, %v720_v45  ;;  %v754_v50 = vsub.bf16 0, %v722_v46 }
 0x181   : > { %v753_v51 = vsub.bf16 0, %v721_v47  ;;  %v755_v52 = vsub.bf16 0, %v723_v48  ;;  %v538_v53 = vpop.f32.mrb[4].mxu0  ;;  %v651_v54 = vpop.f32.mrb[4].mxu1 }
 0x182   : > { %v785_v55 = vmul.bf16 1069105081, %v752_v49  ;;  %v791_v56 = vmul.bf16 1069105081, %v754_v50  ;;  %v2431_v57 = vadd.f32 %v651_v54, %v2384_v25  ;;  %v540_v58 = vpop.f32.mrb[5].mxu0  ;;  %v653_v59 = vpop.f32.mrb[5].mxu1  ;;  %v2437_v1 = vadd.f32 %v538_v53, %v2392_v27 }
 0x183   : > { %v788_v60 = vmul.bf16 1069105081, %v753_v51  ;;  %v794_v61 = vmul.bf16 1069105081, %v755_v52  ;;  %v2434_v62 = vadd.f32 %v653_v59, %v2388_v26  ;;  %v542_v63 = vpop.f32.mrb[6].mxu0  ;;  %v655_v0 = vpop.f32.mrb[6].mxu1  ;;  %v2446_v6 = vadd.f32 %v540_v58, %v2396_v30 }
 0x184   : > { %1688 = vpow.bf16 %v785_v55  ;;  %v2440_v2 = vadd.f32 %v542_v63, %v2392_v27  ;;  %v2443_v3 = vadd.f32 %v655_v0, %v2384_v25  ;;  %v544_v4 = vpop.f32.mrb[7].mxu0  ;;  %v657_v5 = vpop.f32.mrb[7].mxu1  ;;  %v2497_v55 = vrot.slane %v1136_v11, %v375_v24 }
 0x185   : > { %1690 = vpow.bf16 %v791_v56  ;;  %v2449_v7 = vadd.f32 %v544_v4, %v2396_v30  ;;  %v2452_v8 = vadd.f32 %v657_v5, %v2388_v26 }
 0x186   : > { %1692 = vpow.bf16 %v788_v60  ;;  %v724_v9 = vpack.c.bf16 %v2440_v2, %v2437_v1  ;;  %v726_v10 = vpack.c.bf16 %v2443_v3, %v2431_v57  ;;  %v2505_v60 = vrot.slane %v1136_v11, %v383_v21 }
 0x187   : > { %1694 = vpow.bf16 %v794_v61  ;;  %v725_v12 = vpack.c.bf16 %v2449_v7, %v2446_v6  ;;  %v727_v13 = vpack.c.bf16 %v2452_v8, %v2434_v62 }
 0x188   : > { %v756_v14 = vsub.bf16 0, %v724_v9  ;;  %v758_v15 = vsub.bf16 0, %v726_v10 }
 0x189   : > { %v757_v16 = vsub.bf16 0, %v725_v12  ;;  %v759_v17 = vsub.bf16 0, %v727_v13  ;;  %v548_v18 = vpop.f32.mrb[8].mxu0  ;;  %v661_v23 = vpop.f32.mrb[8].mxu1 }
 0x18a   : > { %v797_v29 = vmul.bf16 1069105081, %v756_v14  ;;  %v803_v32 = vmul.bf16 1069105081, %v758_v15  ;;  %v2468_v33 = vadd.f32 %v661_v23, %v2384_v25  ;;  %v550_v35 = vpop.f32.mrb[9].mxu0  ;;  %v663_v36 = vpop.f32.mrb[9].mxu1  ;;  %v2478_v22 = vadd.f32 %v548_v18, %v2392_v27 }
 0x18b   : > { %v800_v41 = vmul.bf16 1069105081, %v757_v16  ;;  %v806_v45 = vmul.bf16 1069105081, %v759_v17  ;;  %v2475_v46 = vadd.f32 %v663_v36, %v2388_v26  ;;  %v552_v47 = vpop.f32.mrb[10].mxu0  ;;  %v665_v48 = vpop.f32.mrb[10].mxu1  ;;  %v2487_v52 = vadd.f32 %v550_v35, %v2396_v30 }
 0x18c   : > { %3022 = vst [vmem:[#allocation17_spill] sm:$0xff] %v2468_v33  ;;  %1696 = vpow.bf16 %v797_v29  ;;  %v2481_v49 = vadd.f32 %v552_v47, %v2392_v27  ;;  %v2484_v50 = vadd.f32 %v665_v48, %v2384_v25  ;;  %v554_v51 = vpop.f32.mrb[11].mxu0  ;;  %v667_v20 = vpop.f32.mrb[11].mxu1 }
 0x18d   : > { %3023 = vst [vmem:[#allocation18_spill] sm:$0xff] %v2475_v46  ;;  %1698 = vpow.bf16 %v803_v32  ;;  %3025 = vst [vmem:[#allocation20_spill] sm:$0xff] %v2487_v52  ;;  %v2490_v53 = vadd.f32 %v554_v51, %v2396_v30  ;;  %v2493_v54 = vadd.f32 %v667_v20, %v2388_v26 }
 0x18e   : > { %3024 = vst [vmem:[#allocation19_spill] sm:$0xff] %v2484_v50  ;;  %1700 = vpow.bf16 %v800_v41  ;;  %v728_v56 = vpack.c.bf16 %v2481_v49, %v2478_v22  ;;  %v730_v58 = vpack.c.bf16 %v2484_v50, %v2468_v33 }
 0x18f   : > { %3026 = vst [vmem:[#allocation21_spill] sm:$0xff] %v2490_v53  ;;  %3027 = vst [vmem:[#allocation22_spill] sm:$0xff] %v2493_v54  ;;  %v1689_v59 = vpop.eup %1688  ;;  %1702 = vpow.bf16 %v806_v45  ;;  %v729_v61 = vpack.c.bf16 %v2490_v53, %v2487_v52  ;;  %v731_v24 = vpack.c.bf16 %v2493_v54, %v2475_v46 }
 0x190   : > { %v1691_v63 = vpop.eup %1690  ;;  %v880_v0 = vunpack.c.l.bf16 %v1689_v59  ;;  %v884_v4 = vunpack.c.h.bf16 %v1689_v59  ;;  %v2511_v5 = vsub.bf16 0, %v728_v56  ;;  %v2513_v9 = vsub.bf16 0, %v730_v58 }
 0x191   : > { %v1693_v10 = vpop.eup %1692  ;;  %v882_v12 = vunpack.c.l.bf16 %v1691_v63  ;;  %v886_v13 = vunpack.c.h.bf16 %v1691_v63  ;;  %v2515_v19 = vsub.bf16 0, %v729_v61  ;;  %v2517_v21 = vsub.bf16 0, %v731_v24  ;;  %v558_v11 = vpop.f32.mrb[12].mxu0 }
 0x192   : > { %v671_v14 = vpop.f32.mrb[12].mxu1  ;;  %v1695_v15 = vpop.eup %1694  ;;  %v944_v16 = vadd.f32 1.0, %v880_v0  ;;  %v948_v17 = vadd.f32 1.0, %v884_v4  ;;  %v881_v18 = vunpack.c.l.bf16 %v1693_v10  ;;  %v885_v23 = vunpack.c.h.bf16 %v1693_v10 }
 0x193   : > { %v560_v29 = vpop.f32.mrb[13].mxu0  ;;  %v673_v32 = vpop.f32.mrb[13].mxu1  ;;  %v946_v35 = vadd.f32 1.0, %v882_v12  ;;  %v950_v36 = vadd.f32 1.0, %v886_v13  ;;  %v883_v41 = vunpack.c.l.bf16 %v1695_v15  ;;  %v887_v45 = vunpack.c.h.bf16 %v1695_v15 }
 0x194   : > { %v562_v47 = vpop.f32.mrb[14].mxu0  ;;  %v675_v48 = vpop.f32.mrb[14].mxu1  ;;  %1704 = vrcp.f32 %v944_v16  ;;  %v945_v51 = vadd.f32 1.0, %v881_v18  ;;  %v949_v20 = vadd.f32 1.0, %v885_v23  ;;  %v2526_v10 = vadd.f32 %v558_v11, %v2392_v27 }
 0x195   : > { %v564_v58 = vpop.f32.mrb[15].mxu0  ;;  %v2520_v59 = vpop.f32.mrb[15].mxu1  ;;  %1706 = vrcp.f32 %v948_v17  ;;  %v947_v61 = vadd.f32 1.0, %v883_v41  ;;  %v951_v24 = vadd.f32 1.0, %v887_v45  ;;  %v2529_v13 = vadd.f32 %v671_v14, %v2384_v25 }
 0x196   : > { %1708 = vrcp.f32 %v946_v35  ;;  %v2532_v15 = vadd.f32 %v560_v29, %v2396_v30  ;;  %v2535_v16 = vadd.f32 %v673_v32, %v2388_v26  ;;  %v2538_v35 = vadd.f32 %v562_v47, %v2392_v27 }
 0x197   : > { %v1697_v12 = vpop.eup %1696  ;;  %1710 = vrcp.f32 %v950_v36  ;;  %v2541_v14 = vadd.f32 %v675_v48, %v2384_v25 }
 0x198   : > { %3028 = vst [vmem:[#allocation23_spill] sm:$0xff] %v2532_v15  ;;  %3029 = vst [vmem:[#allocation24_spill] sm:$0xff] %v2535_v16  ;;  %v1699_v17 = vpop.eup %1698  ;;  %1712 = vrcp.f32 %v945_v51  ;;  %v888_v18 = vunpack.c.l.bf16 %v1697_v12  ;;  %v892_v23 = vunpack.c.h.bf16 %v1697_v12 }
 0x199   : > { %v1701_v11 = vpop.eup %1700  ;;  %1714 = vrcp.f32 %v949_v20  ;;  %v890_v41 = vunpack.c.l.bf16 %v1699_v17  ;;  %v894_v36 = vunpack.c.h.bf16 %v1699_v17  ;;  %3030 = vst [vmem:[#allocation25_spill] sm:$0xff] %v2541_v14  ;;  %v2543_v45 = vpop.f32.mrb[16].mxu0 }
 0x19a   : > { %v2545_v29 = vpop.f32.mrb[16].mxu1  ;;  %v1703_v32 = vpop.eup %1702  ;;  %1716 = vrcp.f32 %v947_v61  ;;  %v952_v4 = vadd.f32 1.0, %v888_v18  ;;  %v956_v51 = vadd.f32 1.0, %v892_v23  ;;  %v889_v0 = vunpack.c.l.bf16 %v1701_v11 }
 0x19b   : > { %v2547_v12 = vpop.f32.mrb[17].mxu0  ;;  %v2549_v47 = vpop.f32.mrb[17].mxu1  ;;  %1718 = vrcp.f32 %v951_v24  ;;  %v954_v20 = vadd.f32 1.0, %v890_v41  ;;  %v958_v63 = vadd.f32 1.0, %v894_v36  ;;  %v893_v17 = vunpack.c.h.bf16 %v1701_v11 }
 0x19c   : > { %v2551_v56 = vpop.f32.mrb[18].mxu0  ;;  %v2553_v48 = vpop.f32.mrb[18].mxu1  ;;  %1720 = vrcp.f32 %v952_v4  ;;  %v953_v54 = vadd.f32 1.0, %v889_v0  ;;  %v891_v46 = vunpack.c.l.bf16 %v1703_v32  ;;  %v895_v53 = vunpack.c.h.bf16 %v1703_v32 }
 0x19d   : > { %v2555_v61 = vpop.f32.mrb[19].mxu0  ;;  %v2557_v18 = vpop.f32.mrb[19].mxu1  ;;  %1722 = vrcp.f32 %v956_v51  ;;  %v957_v23 = vadd.f32 1.0, %v893_v17  ;;  %v732_v24 = vpack.c.bf16 %v2538_v35, %v2526_v10  ;;  %v734_v11 = vpack.c.bf16 %v2541_v14, %v2529_v13 }
 0x19e   : > { %v1705_v41 = vpop.eup %1704  ;;  %1724 = vrcp.f32 %v954_v20  ;;  %v955_v36 = vadd.f32 1.0, %v891_v46  ;;  %v959_v52 = vadd.f32 1.0, %v895_v53  ;;  %v2564_v0 = vadd.f32 %v564_v58, %v2396_v30 }
 0x19f   : > { %v1707_v4 = vpop.eup %1706  ;;  %v1072_v32 = vmul.f32 %v1705_v41, %v2405_v37  ;;  %1726 = vrcp.f32 %v958_v63  ;;  %v764_v50 = vsub.bf16 0, %v732_v24  ;;  %v766_v51 = vsub.bf16 0, %v734_v11 }
 0x1a0   : > { %3031 = vst [vmem:[#allocation26_spill] sm:$0xff] %v2564_v0  ;;  %v1709_v17 = vpop.eup %1708  ;;  %v1076_v33 = vmul.f32 %v1707_v4, %v2408_v38  ;;  %1728 = vrcp.f32 %v953_v54  ;;  %v733_v14 = vpack.c.bf16 %v2564_v0, %v2532_v15  ;;  %v2572_v46 = vadd.f32 %v2520_v59, %v2388_v26 }
 0x1a1   : > { %v1711_v53 = vpop.eup %1710  ;;  %v1158_v58 = vmul.f32 %v2465_v28, %v1072_v32  ;;  %v1074_v20 = vmul.f32 %v1709_v17, %v2399_v31  ;;  %1730 = vrcp.f32 %v957_v23  ;;  %v821_v37 = vmul.bf16 1069105081, %v764_v50  ;;  %v2576_v63 = vpop.f32.mrb[20].mxu0 }
 0x1a2   : > { %3032 = vst [vmem:[#allocation27_spill] sm:$0xff] %v2572_v46  ;;  %v2578_v24 = vpop.f32.mrb[20].mxu1  ;;  %v1713_v38 = vpop.eup %1712  ;;  %v1162_v54 = vmul.f32 %v2465_v28, %v1076_v33  ;;  %v1078_v11 = vmul.f32 %v1711_v53, %v2411_v39  ;;  %1732 = vrcp.f32 %v955_v36  ;;  %v827_v41 = vmul.bf16 1069105081, %v766_v51 }
 0x1a3   : > { %v2582_v59 = vpop.f32.mrb[21].mxu0  ;;  %v2584_v4 = vpop.f32.mrb[21].mxu1  ;;  %v1160_v31 = vmul.f32 %v2472_v40, %v1074_v20  ;;  %v1073_v50 = vmul.f32 %v1713_v38, %v2414_v42  ;;  %1734 = vrcp.f32 %v959_v52  ;;  %v765_v23 = vsub.bf16 0, %v733_v14 }
 0x1a4   : > { %v1715_v32 = vpop.eup %1714  ;;  %v2588_v17 = vpop.f32.mrb[22].mxu0  ;;  %v1164_v39 = vmul.f32 %v2472_v40, %v1078_v11  ;;  %v3033_v51 = vmul.bf16 1069105081, %v2511_v5  ;;  %v735_v53 = vpack.c.bf16 %v2572_v46, %v2535_v16  ;;  %v3036_v15 = vmul.bf16 1069105081, %v2513_v9 }
 0x1a5   : > { %v2590_v0 = vpop.f32.mrb[22].mxu1  ;;  %v1717_v33 = vpop.eup %1716  ;;  %v1077_v36 = vmul.f32 %v1715_v32, %v2417_v43  ;;  %v1159_v14 = vmul.f32 %v2497_v55, %v1073_v50  ;;  %v824_v11 = vmul.bf16 1069105081, %v765_v23 }
 0x1a6   : > { %1736 = vpow.bf16 %v3033_v51  ;;  %v2598_v20 = vpop.f32.mrb[23].mxu0  ;;  %v2600_v42 = vpop.f32.mrb[23].mxu1  ;;  %v1075_v38 = vmul.f32 %v1717_v33, %v2402_v34  ;;  %v3037_v51 = vmul.bf16 1069105081, %v2515_v19  ;;  %v3038_v34 = vmul.bf16 1069105081, %v2517_v21 }
 0x1a7   : > { %3034 = vst [vmem:[#allocation28_spill] sm:$0xff] %v2598_v20  ;;  %3035 = vst [vmem:[#allocation29_spill] sm:$0xff] %v2600_v42  ;;  %v1719_v52 = vpop.eup %1718  ;;  %1738 = vpow.bf16 %v3036_v15  ;;  %v1163_v5 = vmul.f32 %v2497_v55, %v1077_v36  ;;  %v767_v20 = vsub.bf16 0, %v735_v53  ;;  %v1222_v42 = vadd.f32 %v1159_v14, %v1158_v58  ;;  %v1270_v14 = vld [vmem:[#allocation2] sm:$0xff] }
 0x1a8   : > { %v1721_v43 = vpop.eup %1720  ;;  %v1079_v32 = vmul.f32 %v1719_v52, %v2420_v44  ;;  %1740 = vpow.bf16 %v3037_v51  ;;  %v1161_v16 = vmul.f32 %v2505_v60, %v1075_v38 }
 0x1a9   : > { %v1723_v46 = vpop.eup %1722  ;;  %v1080_v50 = vmul.f32 %v1721_v43, %v2437_v1  ;;  %1742 = vpow.bf16 %v3038_v34  ;;  %v1223_v15 = vadd.f32 %v1163_v5, %v1162_v54  ;;  %v1238_v19 = vadd.f32 %v1222_v42, %v1160_v31  ;;  %v2618_v53 = vpop.f32.mrb[24].mxu0 }
 0x1aa   : > { %v1725_v9 = vpop.eup %1724  ;;  %v1165_v23 = vmul.f32 %v2505_v60, %v1079_v32  ;;  %v1084_v33 = vmul.f32 %v1723_v46, %v2440_v2  ;;  %1744 = vpow.bf16 %v821_v37  ;;  %v2620_v1 = vpop.f32.mrb[24].mxu1  ;;  %v830_v43 = vmul.bf16 1069105081, %v767_v20 }
 0x1ab   : > { %v1727_v44 = vpop.eup %1726  ;;  %v1166_v36 = vmul.f32 %v2465_v28, %v1080_v50  ;;  %v1082_v58 = vmul.f32 %v1725_v9, %v2431_v57  ;;  %1746 = vpow.bf16 %v827_v41  ;;  %v1239_v52 = vadd.f32 %v1223_v15, %v1164_v39  ;;  %v2624_v2 = vpop.f32.mrb[25].mxu0  ;;  %v1271_v57 = vld [vmem:[#allocation2 + $0x8] sm:$0xff] }
 0x1ac   : > { %v1729_v21 = vpop.eup %1728  ;;  %v1170_v54 = vmul.f32 %v2465_v28, %v1084_v33  ;;  %v1086_v38 = vmul.f32 %v1727_v44, %v2443_v3  ;;  %1748 = vpow.bf16 %v824_v11  ;;  %v2626_v46 = vpop.f32.mrb[25].mxu1  ;;  %v1254_v31 = vadd.f32 %v1238_v19, %v1161_v16 }
 0x1ad   : > { %v1731_v37 = vpop.eup %1730  ;;  %v1168_v41 = vmul.f32 %v2472_v40, %v1082_v58  ;;  %v1081_v42 = vmul.f32 %v1729_v21, %v2446_v6  ;;  %v2630_v5 = vpop.f32.mrb[26].mxu0  ;;  %v1255_v51 = vadd.f32 %v1239_v52, %v1165_v23  ;;  %v2638_v50 = vadd.f32 %v2543_v45, %v2392_v27 }
 0x1ae   : > { %v2632_v39 = vpop.f32.mrb[26].mxu1  ;;  %v1733_v32 = vpop.eup %1732  ;;  %v1172_v3 = vmul.f32 %v2472_v40, %v1086_v38  ;;  %v1085_v11 = vmul.f32 %v1731_v37, %v2449_v7  ;;  %v1286_v20 = vadd.f32 %v1270_v14, %v1254_v31  ;;  %1750 = vpow.bf16 %v830_v43 }
 0x1af   : > { %v2640_v16 = vpop.f32.mrb[27].mxu0  ;;  %v2642_v34 = vpop.f32.mrb[27].mxu1  ;;  %v1167_v9 = vmul.f32 %v2497_v55, %v1081_v42  ;;  %v1083_v15 = vmul.f32 %v1733_v32, %v2434_v62  ;;  %v1287_v23 = vadd.f32 %v1271_v57, %v1255_v51  ;;  %v2650_v45 = vadd.f32 %v2545_v29, %v2384_v25  ;;  %v1272_v51 = vld [vmem:[#allocation2 + $0x10] sm:$0xff] }
 0x1b0   : > { %v1735_v6 = vpop.eup %1734  ;;  %v1171_v33 = vmul.f32 %v2497_v55, %v1085_v11  ;;  %1302 = vst [vmem:[#allocation2] sm:$0xff] %v1286_v20  ;;  %v2655_v21 = vadd.f32 %v2547_v12, %v2396_v30  ;;  %v2659_v62 = vadd.f32 %v2549_v47, %v2388_v26  ;;  %v2664_v42 = vadd.f32 %v2551_v56, %v2392_v27 }
 0x1b1   : > { %v1087_v7 = vmul.f32 %v1735_v6, %v2452_v8  ;;  %v1737_v44 = vpop.eup %1736  ;;  %v1224_v19 = vadd.f32 %v1167_v9, %v1166_v36  ;;  %v1169_v58 = vmul.f32 %v2505_v60, %v1083_v15  ;;  %1303 = vst [vmem:[#allocation2 + $0x8] sm:$0xff] %v1287_v23  ;;  %v2666_v12 = vpop.f32.mrb[28].mxu0  ;;  %v1273_v23 = vld [vmem:[#allocation2 + $0x18] sm:$0xff] }
 0x1b2   : > { %v1739_v52 = vpop.eup %1738  ;;  %v1225_v8 = vadd.f32 %v1171_v33, %v1170_v54  ;;  %v896_v29 = vunpack.c.l.bf16 %v1737_v44  ;;  %v900_v38 = vunpack.c.h.bf16 %v1737_v44  ;;  %v2668_v43 = vpop.f32.mrb[28].mxu1 }
 0x1b3   : > { %v1173_v14 = vmul.f32 %v2505_v60, %v1087_v7  ;;  %v1741_v37 = vpop.eup %1740  ;;  %v1240_v31 = vadd.f32 %v1224_v19, %v1168_v41  ;;  %v898_v36 = vunpack.c.l.bf16 %v1739_v52  ;;  %v902_v57 = vunpack.c.h.bf16 %v1739_v52  ;;  %3039 = vst [vmem:[#allocation30_spill] sm:$0xff] %v2668_v43  ;;  %v2670_v20 = vpop.f32.mrb[29].mxu0 }
 0x1b4   : > { %v1743_v47 = vpop.eup %1742  ;;  %v1241_v32 = vadd.f32 %v1225_v8, %v1172_v3  ;;  %v960_v54 = vadd.f32 1.0, %v896_v29  ;;  %v964_v11 = vadd.f32 1.0, %v900_v38  ;;  %v897_v6 = vunpack.c.l.bf16 %v1741_v37  ;;  %3040 = vst [vmem:[#allocation31_spill] sm:$0xff] %v2670_v20  ;;  %v2672_v9 = vpop.f32.mrb[29].mxu1 }
 0x1b5   : > { %3041 = vst [vmem:[#allocation32_spill] sm:$0xff] %v2672_v9  ;;  %v1745_v41 = vpop.eup %1744  ;;  %v1256_v15 = vadd.f32 %v1240_v31, %v1169_v58  ;;  %v962_v33 = vadd.f32 1.0, %v898_v36  ;;  %v966_v56 = vadd.f32 1.0, %v902_v57  ;;  %v901_v7 = vunpack.c.h.bf16 %v1741_v37  ;;  %v2674_v44 = vpop.f32.mrb[30].mxu0 }
 0x1b6   : > { %v2676_v19 = vpop.f32.mrb[30].mxu1  ;;  %v1747_v52 = vpop.eup %1746  ;;  %v1257_v3 = vadd.f32 %v1241_v32, %v1173_v14  ;;  %1752 = vrcp.f32 %v960_v54  ;;  %v961_v8 = vadd.f32 1.0, %v897_v6  ;;  %v899_v29 = vunpack.c.l.bf16 %v1743_v47 }
 0x1b7   : > { %3042 = vst [vmem:[#allocation33_spill] sm:$0xff] %v2676_v19  ;;  %v2678_v38 = vpop.f32.mrb[31].mxu0  ;;  %v2680_v20 = vpop.f32.mrb[31].mxu1  ;;  %v1288_v43 = vadd.f32 %v1272_v51, %v1256_v15  ;;  %1754 = vrcp.f32 %v964_v11  ;;  %v965_v58 = vadd.f32 1.0, %v901_v7  ;;  %v903_v31 = vunpack.c.h.bf16 %v1743_v47 }
 0x1b8   : > { %3043 = vst [vmem:[#allocation34_spill] sm:$0xff] %v2678_v38  ;;  %3044 = vst [vmem:[#allocation35_spill] sm:$0xff] %v2680_v20  ;;  %v1749_v9 = vpop.eup %1748  ;;  %v1289_v36 = vadd.f32 %v1273_v23, %v1257_v3  ;;  %1756 = vrcp.f32 %v962_v33  ;;  %v963_v37 = vadd.f32 1.0, %v899_v29  ;;  %v904_v57 = vunpack.c.l.bf16 %v1745_v41 }
 0x1b9   : > { %1304 = vst [vmem:[#allocation2 + $0x10] sm:$0xff] %v1288_v43  ;;  %1758 = vrcp.f32 %v966_v56  ;;  %v967_v19 = vadd.f32 1.0, %v903_v31  ;;  %v908_v14 = vunpack.c.h.bf16 %v1745_v41  ;;  %v906_v32 = vunpack.c.l.bf16 %v1747_v52  ;;  %v1751_v54 = vpop.eup %1750 }
 0x1ba   : > { %1305 = vst [vmem:[#allocation2 + $0x18] sm:$0xff] %v1289_v36  ;;  %1760 = vrcp.f32 %v961_v8  ;;  %v968_v6 = vadd.f32 1.0, %v904_v57  ;;  %v910_v38 = vunpack.c.h.bf16 %v1747_v52  ;;  %v905_v20 = vunpack.c.l.bf16 %v1749_v9 }
 0x1bb   : > { %1762 = vrcp.f32 %v965_v58  ;;  %v972_v51 = vadd.f32 1.0, %v908_v14  ;;  %v970_v11 = vadd.f32 1.0, %v906_v32  ;;  %v909_v15 = vunpack.c.h.bf16 %v1749_v9 }
 0x1bc   : > { %1764 = vrcp.f32 %v963_v37  ;;  %v974_v47 = vadd.f32 1.0, %v910_v38  ;;  %v969_v23 = vadd.f32 1.0, %v905_v20  ;;  %v907_v33 = vunpack.c.l.bf16 %v1751_v54 }
 0x1bd   : > { %1766 = vrcp.f32 %v967_v19  ;;  %v973_v43 = vadd.f32 1.0, %v909_v15  ;;  %v911_v56 = vunpack.c.h.bf16 %v1751_v54  ;;  %v736_v41 = vpack.c.bf16 %v2664_v42, %v2638_v50  ;;  %v3046_v15 = vld [vmem:[#allocation19_spill] sm:$0xff] }
 0x1be   : > { %1768 = vrcp.f32 %v968_v6  ;;  %v971_v7 = vadd.f32 1.0, %v907_v33  ;;  %v2686_v52 = vadd.f32 %v2553_v48, %v2384_v25  ;;  %v2690_v3 = vadd.f32 %v2555_v61, %v2396_v30  ;;  %v3045_v6 = vld [vmem:[#allocation17_spill] sm:$0xff] }
 0x1bf   : > { %1770 = vrcp.f32 %v972_v51  ;;  %v975_v9 = vadd.f32 1.0, %v911_v56  ;;  %v768_v20 = vsub.bf16 0, %v736_v41  ;;  %v2694_v19 = vadd.f32 %v2557_v18, %v2388_v26 }
 0x1c0   : > { %v1753_v8 = vpop.eup %1752  ;;  %1772 = vrcp.f32 %v970_v11  ;;  %v738_v29 = vpack.c.bf16 %v2686_v52, %v2650_v45  ;;  %v737_v48 = vpack.c.bf16 %v2690_v3, %v2655_v21  ;;  %v2702_v38 = vadd.f32 %v2576_v63, %v2392_v27 }
 0x1c1   : > { %v1755_v61 = vpop.eup %1754  ;;  %v1088_v58 = vmul.f32 %v1753_v8, %v2478_v22  ;;  %1774 = vrcp.f32 %v974_v47  ;;  %v833_v31 = vmul.bf16 1069105081, %v768_v20  ;;  %v739_v18 = vpack.c.bf16 %v2694_v19, %v2659_v62 }
 0x1c2   : > { %v1757_v36 = vpop.eup %1756  ;;  %v1092_v37 = vmul.f32 %v1755_v61, %v2481_v49  ;;  %1776 = vrcp.f32 %v969_v23  ;;  %v770_v57 = vsub.bf16 0, %v738_v29  ;;  %v769_v14 = vsub.bf16 0, %v737_v48  ;;  %v3047_v23 = vld [vmem:[#allocation20_spill] sm:$0xff]  ;;  %v3048_v48 = vld [vmem:[#allocation21_spill] sm:$0xff] }
 0x1c3   : > { %v1759_v32 = vpop.eup %1758  ;;  %v1174_v54 = vmul.f32 %v2465_v28, %v1088_v58  ;;  %v1090_v63 = vmul.f32 %v1757_v36, %v3045_v6  ;;  %1778 = vrcp.f32 %v973_v43  ;;  %v771_v51 = vsub.bf16 0, %v739_v18  ;;  %v3049_v36 = vld [vmem:[#allocation18_spill] sm:$0xff] }
 0x1c4   : > { %v1761_v11 = vpop.eup %1760  ;;  %v1178_v22 = vmul.f32 %v2465_v28, %v1092_v37  ;;  %v1094_v47 = vmul.f32 %v1759_v32, %v3046_v15  ;;  %1780 = vrcp.f32 %v971_v7  ;;  %v839_v33 = vmul.bf16 1069105081, %v770_v57 }
 0x1c5   : > { %v1763_v56 = vpop.eup %1762  ;;  %v1176_v49 = vmul.f32 %v2472_v40, %v1090_v63  ;;  %v1089_v41 = vmul.f32 %v1761_v11, %v3047_v23  ;;  %1782 = vrcp.f32 %v975_v9  ;;  %v836_v20 = vmul.bf16 1069105081, %v769_v14  ;;  %v3050_v14 = vld [vmem:[#allocation22_spill] sm:$0xff] }
 0x1c6   : > { %v1765_v8 = vpop.eup %1764  ;;  %v1180_v29 = vmul.f32 %v2472_v40, %v1094_v47  ;;  %v1093_v43 = vmul.f32 %v1763_v56, %v3048_v48  ;;  %1784 = vpow.bf16 %v833_v31  ;;  %v842_v61 = vmul.bf16 1069105081, %v771_v51 }
 0x1c7   : > { %v1767_v58 = vpop.eup %1766  ;;  %v1175_v18 = vmul.f32 %v2497_v55, %v1089_v41  ;;  %v1091_v7 = vmul.f32 %v1765_v8, %v3049_v36  ;;  %1786 = vpow.bf16 %v839_v33  ;;  %v2720_v37 = vadd.f32 %v2578_v24, %v2384_v25  ;;  %v1274_v8 = vld [vmem:[#allocation2 + $0x20] sm:$0xff] }
 0x1c8   : > { %v1769_v57 = vpop.eup %1768  ;;  %v1179_v9 = vmul.f32 %v2497_v55, %v1093_v43  ;;  %v1095_v32 = vmul.f32 %v1767_v58, %v3050_v14  ;;  %1788 = vpow.bf16 %v836_v20  ;;  %v2726_v31 = vadd.f32 %v2582_v59, %v2396_v30  ;;  %v1275_v58 = vld [vmem:[#allocation2 + $0x28] sm:$0xff] }
 0x1c9   : > { %v1771_v6 = vpop.eup %1770  ;;  %v1226_v63 = vadd.f32 %v1175_v18, %v1174_v54  ;;  %v1177_v51 = vmul.f32 %v2505_v60, %v1091_v7  ;;  %v1096_v11 = vmul.f32 %v1769_v57, %v2526_v10  ;;  %1790 = vpow.bf16 %v842_v61  ;;  %v3052_v18 = vld [vmem:[#allocation23_spill] sm:$0xff] }
 0x1ca   : > { %v1773_v15 = vpop.eup %1772  ;;  %v1227_v24 = vadd.f32 %v1179_v9, %v1178_v22  ;;  %v1181_v47 = vmul.f32 %v2505_v60, %v1095_v32  ;;  %v1100_v33 = vmul.f32 %v1771_v6, %v2538_v35  ;;  %v2734_v56 = vadd.f32 %v2584_v4, %v2388_v26  ;;  %v3051_v35 = vld [vmem:[#allocation25_spill] sm:$0xff]  ;;  %v3053_v9 = vld [vmem:[#allocation26_spill] sm:$0xff] }
 0x1cb   : > { %v1775_v23 = vpop.eup %1774  ;;  %v1242_v59 = vadd.f32 %v1226_v63, %v1176_v49  ;;  %v1182_v41 = vmul.f32 %v2465_v28, %v1096_v11  ;;  %v1098_v54 = vmul.f32 %v1773_v15, %v2529_v13  ;;  %v2740_v10 = vadd.f32 %v2588_v17, %v2392_v27 }
 0x1cc   : > { %v1777_v20 = vpop.eup %1776  ;;  %v1243_v22 = vadd.f32 %v1227_v24, %v1180_v29  ;;  %v1186_v48 = vmul.f32 %v2465_v28, %v1100_v33  ;;  %v1102_v43 = vmul.f32 %v1775_v23, %v3051_v35  ;;  %v2746_v4 = vadd.f32 %v2590_v0, %v2384_v25  ;;  %v3055_v23 = vld [vmem:[#allocation27_spill] sm:$0xff] }
 0x1cd   : > { %v1779_v49 = vpop.eup %1778  ;;  %v1258_v61 = vadd.f32 %v1242_v59, %v1177_v51  ;;  %v1184_v13 = vmul.f32 %v2472_v40, %v1098_v54  ;;  %v1097_v36 = vmul.f32 %v1777_v20, %v3052_v18  ;;  %v740_v17 = vpack.c.bf16 %v2740_v10, %v2702_v38  ;;  %v3054_v51 = vld [vmem:[#allocation24_spill] sm:$0xff] }
 0x1ce   : > { %v1781_v29 = vpop.eup %1780  ;;  %v1259_v7 = vadd.f32 %v1243_v22, %v1181_v47  ;;  %v1188_v57 = vmul.f32 %v2472_v40, %v1102_v43  ;;  %v1101_v14 = vmul.f32 %v1779_v49, %v3053_v9  ;;  %v742_v0 = vpack.c.bf16 %v2746_v4, %v2720_v37 }
 0x1cf   : > { %v1783_v32 = vpop.eup %1782  ;;  %v1290_v6 = vadd.f32 %v1274_v8, %v1258_v61  ;;  %v1183_v63 = vmul.f32 %v2497_v55, %v1097_v36  ;;  %v1099_v11 = vmul.f32 %v1781_v29, %v3054_v51  ;;  %v772_v15 = vsub.bf16 0, %v740_v17  ;;  %v3056_v8 = vld [vmem:[#allocation28_spill] sm:$0xff] }
 0x1d0   : > { %v1291_v24 = vadd.f32 %v1275_v58, %v1259_v7  ;;  %v1187_v33 = vmul.f32 %v2497_v55, %v1101_v14  ;;  %v1103_v59 = vmul.f32 %v1783_v32, %v3055_v23  ;;  %v2760_v47 = vsub.bf16 0, %v742_v0  ;;  %v1276_v0 = vld [vmem:[#allocation2 + $0x30] sm:$0xff] }
 0x1d1   : > { %v1785_v54 = vpop.eup %1784  ;;  %1306 = vst [vmem:[#allocation2 + $0x20] sm:$0xff] %v1290_v6  ;;  %v1228_v20 = vadd.f32 %v1183_v63, %v1182_v41  ;;  %v1185_v22 = vmul.f32 %v2505_v60, %v1099_v11  ;;  %v845_v35 = vmul.bf16 1069105081, %v772_v15  ;;  %v2765_v43 = vadd.f32 %v3056_v8, %v2396_v30  ;;  %v1277_v11 = vld [vmem:[#allocation2 + $0x38] sm:$0xff] }
 0x1d2   : > { %v1787_v49 = vpop.eup %1786  ;;  %1307 = vst [vmem:[#allocation2 + $0x28] sm:$0xff] %v1291_v24  ;;  %v1229_v61 = vadd.f32 %v1187_v33, %v1186_v48  ;;  %v1189_v58 = vmul.f32 %v2505_v60, %v1103_v59  ;;  %v912_v18 = vunpack.c.l.bf16 %v1785_v54  ;;  %v916_v36 = vunpack.c.h.bf16 %v1785_v54 }
 0x1d3   : > { %v1789_v17 = vpop.eup %1788  ;;  %v1244_v29 = vadd.f32 %v1228_v20, %v1184_v13  ;;  %v914_v7 = vunpack.c.l.bf16 %v1787_v49  ;;  %v918_v9 = vunpack.c.h.bf16 %v1787_v49  ;;  %1792 = vpow.bf16 %v845_v35 }
 0x1d4   : > { %v1791_v41 = vpop.eup %1790  ;;  %v1245_v14 = vadd.f32 %v1229_v61, %v1188_v57  ;;  %v976_v32 = vadd.f32 1.0, %v912_v18  ;;  %v980_v6 = vadd.f32 1.0, %v916_v36  ;;  %v913_v63 = vunpack.c.l.bf16 %v1789_v17  ;;  %v3057_v61 = vld [vmem:[#allocation29_spill] sm:$0xff] }
 0x1d5   : > { %v1260_v51 = vadd.f32 %v1244_v29, %v1185_v22  ;;  %v978_v15 = vadd.f32 1.0, %v914_v7  ;;  %v982_v24 = vadd.f32 1.0, %v918_v9  ;;  %v917_v48 = vunpack.c.h.bf16 %v1789_v17 }
 0x1d6   : > { %v1261_v33 = vadd.f32 %v1245_v14, %v1189_v58  ;;  %1794 = vrcp.f32 %v976_v32  ;;  %v977_v23 = vadd.f32 1.0, %v913_v63  ;;  %v915_v59 = vunpack.c.l.bf16 %v1791_v41 }
 0x1d7   : > { %v1292_v54 = vadd.f32 %v1276_v0, %v1260_v51  ;;  %1796 = vrcp.f32 %v980_v6  ;;  %v981_v13 = vadd.f32 1.0, %v917_v48  ;;  %v919_v20 = vunpack.c.h.bf16 %v1791_v41 }
 0x1d8   : > { %v1293_v35 = vadd.f32 %v1277_v11, %v1261_v33  ;;  %1798 = vrcp.f32 %v978_v15  ;;  %v979_v57 = vadd.f32 1.0, %v915_v59  ;;  %v851_v8 = vmul.bf16 1069105081, %v2760_v47 }
 0x1d9   : > { %1308 = vst [vmem:[#allocation2 + $0x30] sm:$0xff] %v1292_v54  ;;  %1800 = vrcp.f32 %v982_v24  ;;  %v983_v22 = vadd.f32 1.0, %v919_v20  ;;  %v741_v49 = vpack.c.bf16 %v2765_v43, %v2726_v31  ;;  %v2773_v58 = vadd.f32 %v3057_v61, %v2388_v26 }
 0x1da   : > { %1309 = vst [vmem:[#allocation2 + $0x38] sm:$0xff] %v1293_v35  ;;  %1802 = vrcp.f32 %v977_v23  ;;  %v2777_v18 = vadd.f32 %v2618_v53, %v2392_v27  ;;  %v2781_v36 = vadd.f32 %v2620_v1, %v2384_v25  ;;  %v2785_v47 = vadd.f32 %v2624_v2, %v2396_v30 }
 0x1db   : > { %1804 = vrcp.f32 %v981_v13  ;;  %v773_v17 = vsub.bf16 0, %v741_v49  ;;  %v743_v29 = vpack.c.bf16 %v2773_v58, %v2734_v56  ;;  %v2791_v7 = vadd.f32 %v2626_v46, %v2388_v26 }
 0x1dc   : > { %1806 = vrcp.f32 %v979_v57  ;;  %v2795_v53 = vadd.f32 %v2630_v5, %v2392_v27  ;;  %v2799_v1 = vadd.f32 %v2632_v39, %v2384_v25  ;;  %v2803_v2 = vadd.f32 %v2640_v16, %v2396_v30 }
 0x1dd   : > { %1808 = vrcp.f32 %v983_v22  ;;  %v848_v9 = vmul.bf16 1069105081, %v773_v17  ;;  %v775_v41 = vsub.bf16 0, %v743_v29  ;;  %v2807_v46 = vadd.f32 %v2642_v34, %v2388_v26 }
 0x1de   : > { %v1793_v14 = vpop.eup %1792  ;;  %1810 = vpow.bf16 %v851_v8  ;;  %v744_v5 = vpack.c.bf16 %v2795_v53, %v2777_v18  ;;  %v746_v39 = vpack.c.bf16 %v2799_v1, %v2781_v36  ;;  %v745_v0 = vpack.c.bf16 %v2803_v2, %v2785_v47 }
 0x1df   : > { %v920_v16 = vunpack.c.l.bf16 %v1793_v14  ;;  %v924_v32 = vunpack.c.h.bf16 %v1793_v14  ;;  %1812 = vpow.bf16 %v848_v9  ;;  %v854_v6 = vmul.bf16 1069105081, %v775_v41 }
 0x1e0   : > { %v1795_v63 = vpop.eup %1794  ;;  %v776_v51 = vsub.bf16 0, %v744_v5  ;;  %v778_v11 = vsub.bf16 0, %v746_v39  ;;  %v777_v34 = vsub.bf16 0, %v745_v0  ;;  %v747_v15 = vpack.c.bf16 %v2807_v46, %v2791_v7 }
 0x1e1   : > { %v1797_v24 = vpop.eup %1796  ;;  %v1104_v48 = vmul.f32 %v1795_v63, %v2638_v50  ;;  %v984_v33 = vadd.f32 1.0, %v920_v16  ;;  %v988_v23 = vadd.f32 1.0, %v924_v32  ;;  %1814 = vpow.bf16 %v854_v6 }
 0x1e2   : > { %v1799_v59 = vpop.eup %1798  ;;  %v1108_v54 = vmul.f32 %v1797_v24, %v2664_v42  ;;  %v857_v13 = vmul.bf16 1069105081, %v776_v51  ;;  %v863_v20 = vmul.bf16 1069105081, %v778_v11  ;;  %v860_v8 = vmul.bf16 1069105081, %v777_v34 }
 0x1e3   : > { %v1801_v35 = vpop.eup %1800  ;;  %v1106_v57 = vmul.f32 %v1799_v59, %v2650_v45  ;;  %1816 = vrcp.f32 %v984_v33  ;;  %v779_v22 = vsub.bf16 0, %v747_v15  ;;  %v1190_v61 = vmul.f32 %v2465_v28, %v1104_v48 }
 0x1e4   : > { %v1803_v49 = vpop.eup %1802  ;;  %v1110_v17 = vmul.f32 %v1801_v35, %v2686_v52  ;;  %1818 = vrcp.f32 %v988_v23  ;;  %v1194_v29 = vmul.f32 %v2465_v28, %v1108_v54  ;;  %v2828_v5 = vadd.f32 %v2666_v12, %v2392_v27 }
 0x1e5   : > { %v1805_v50 = vpop.eup %1804  ;;  %v1105_v9 = vmul.f32 %v1803_v49, %v2655_v21  ;;  %1820 = vpow.bf16 %v857_v13  ;;  %v866_v42 = vmul.bf16 1069105081, %v779_v22  ;;  %v1192_v14 = vmul.f32 %v2472_v40, %v1106_v57  ;;  %v1279_v49 = vld [vmem:[#allocation2 + $0x48] sm:$0xff] }
 0x1e6   : > { %v1807_v41 = vpop.eup %1806  ;;  %v1109_v45 = vmul.f32 %v1805_v50, %v2690_v3  ;;  %1822 = vpow.bf16 %v863_v20  ;;  %v1196_v52 = vmul.f32 %v2472_v40, %v1110_v17  ;;  %v3058_v3 = vld [vmem:[#allocation30_spill] sm:$0xff]  ;;  %v2842_v11 = vadd.f32 %v2674_v44, %v2392_v27  ;;  %v1278_v27 = vld [vmem:[#allocation2 + $0x40] sm:$0xff] }
 0x1e7   : > { %v1809_v39 = vpop.eup %1808  ;;  %v1191_v0 = vmul.f32 %v2497_v55, %v1105_v9  ;;  %v1107_v16 = vmul.f32 %v1807_v41, %v2659_v62  ;;  %1824 = vpow.bf16 %v860_v8  ;;  %v2837_v6 = vadd.f32 %v3058_v3, %v2384_v25  ;;  %v3059_v62 = vld [vmem:[#allocation33_spill] sm:$0xff] }
 0x1e8   : > { %v1195_v21 = vmul.f32 %v2497_v55, %v1109_v45  ;;  %v1111_v32 = vmul.f32 %v1809_v39, %v2694_v19  ;;  %1826 = vpow.bf16 %v866_v42  ;;  %v2846_v34 = vadd.f32 %v3059_v62, %v2384_v25 }
 0x1e9   : > { %v1811_v63 = vpop.eup %1810  ;;  %v1230_v12 = vadd.f32 %v1191_v0, %v1190_v61  ;;  %v1193_v51 = vmul.f32 %v2505_v60, %v1107_v16  ;;  %v748_v13 = vpack.c.bf16 %v2842_v11, %v2828_v5 }
 0x1ea   : > { %v1813_v15 = vpop.eup %1812  ;;  %v1231_v24 = vadd.f32 %v1195_v21, %v1194_v29  ;;  %v1197_v19 = vmul.f32 %v2505_v60, %v1111_v32  ;;  %v922_v48 = vunpack.c.l.bf16 %v1811_v63  ;;  %v926_v33 = vunpack.c.h.bf16 %v1811_v63 }
 0x1eb   : > { %v1246_v23 = vadd.f32 %v1230_v12, %v1192_v14  ;;  %v921_v59 = vunpack.c.l.bf16 %v1813_v15  ;;  %v925_v54 = vunpack.c.h.bf16 %v1813_v15  ;;  %v750_v25 = vpack.c.bf16 %v2846_v34, %v2837_v6 }
 0x1ec   : > { %v1815_v20 = vpop.eup %1814  ;;  %v1247_v35 = vadd.f32 %v1231_v24, %v1196_v52  ;;  %v986_v44 = vadd.f32 1.0, %v922_v48  ;;  %v990_v57 = vadd.f32 1.0, %v926_v33 }
 0x1ed   : > { %v1817_v8 = vpop.eup %1816  ;;  %v1262_v22 = vadd.f32 %v1246_v23, %v1193_v51  ;;  %v985_v61 = vadd.f32 1.0, %v921_v59  ;;  %v989_v17 = vadd.f32 1.0, %v925_v54  ;;  %v923_v50 = vunpack.c.l.bf16 %v1815_v20 }
 0x1ee   : > { %v1819_v29 = vpop.eup %1818  ;;  %v1263_v9 = vadd.f32 %v1247_v35, %v1197_v19  ;;  %v1112_v42 = vmul.f32 %v1817_v8, %v2702_v38  ;;  %1828 = vrcp.f32 %v986_v44  ;;  %v927_v41 = vunpack.c.h.bf16 %v1815_v20  ;;  %v3060_v20 = vld [vmem:[#allocation32_spill] sm:$0xff] }
 0x1ef   : > { %v1294_v14 = vadd.f32 %v1278_v27, %v1262_v22  ;;  %v1116_v45 = vmul.f32 %v1819_v29, %v2740_v10  ;;  %1830 = vrcp.f32 %v990_v57  ;;  %v987_v39 = vadd.f32 1.0, %v923_v50  ;;  %v3062_v22 = vld [vmem:[#allocation34_spill] sm:$0xff] }
 0x1f0   : > { %v1821_v52 = vpop.eup %1820  ;;  %v1295_v0 = vadd.f32 %v1279_v49, %v1263_v9  ;;  %1832 = vrcp.f32 %v985_v61  ;;  %v991_v16 = vadd.f32 1.0, %v927_v41  ;;  %v780_v51 = vsub.bf16 0, %v748_v13  ;;  %v3061_v13 = vld [vmem:[#allocation31_spill] sm:$0xff] }
 0x1f1   : > { %v1823_v21 = vpop.eup %1822  ;;  %1310 = vst [vmem:[#allocation2 + $0x40] sm:$0xff] %v1294_v14  ;;  %1834 = vrcp.f32 %v989_v17  ;;  %v928_v32 = vunpack.c.l.bf16 %v1821_v52  ;;  %v932_v3 = vunpack.c.h.bf16 %v1821_v52  ;;  %v2857_v35 = vadd.f32 %v3060_v20, %v2388_v26  ;;  %v3063_v61 = vld [vmem:[#allocation35_spill] sm:$0xff] }
 0x1f2   : > { %v1825_v63 = vpop.eup %1824  ;;  %1311 = vst [vmem:[#allocation2 + $0x48] sm:$0xff] %v1295_v0  ;;  %1836 = vrcp.f32 %v987_v39  ;;  %v930_v38 = vunpack.c.l.bf16 %v1823_v21  ;;  %v934_v12 = vunpack.c.h.bf16 %v1823_v21  ;;  %v2861_v44 = vadd.f32 %v3061_v13, %v2396_v30  ;;  %v1280_v13 = vld [vmem:[#allocation2 + $0x50] sm:$0xff] }
 0x1f3   : > { %v1827_v62 = vpop.eup %1826  ;;  %1838 = vrcp.f32 %v991_v16  ;;  %v992_v10 = vadd.f32 1.0, %v928_v32  ;;  %v996_v15 = vadd.f32 1.0, %v932_v3  ;;  %v929_v24 = vunpack.c.l.bf16 %v1825_v63 }
 0x1f4   : > { %v994_v19 = vadd.f32 1.0, %v930_v38  ;;  %v998_v48 = vadd.f32 1.0, %v934_v12  ;;  %v933_v33 = vunpack.c.h.bf16 %v1825_v63  ;;  %v931_v23 = vunpack.c.l.bf16 %v1827_v62 }
 0x1f5   : > { %1840 = vrcp.f32 %v992_v10  ;;  %v993_v59 = vadd.f32 1.0, %v929_v24  ;;  %v935_v54 = vunpack.c.h.bf16 %v1827_v62  ;;  %v782_v57 = vsub.bf16 0, %v750_v25 }
 0x1f6   : > { %1842 = vrcp.f32 %v996_v15  ;;  %v997_v27 = vadd.f32 1.0, %v933_v33  ;;  %v995_v8 = vadd.f32 1.0, %v931_v23  ;;  %v2865_v49 = vadd.f32 %v3062_v22, %v2396_v30 }
 0x1f7   : > { %1844 = vrcp.f32 %v994_v19  ;;  %v2869_v17 = vadd.f32 %v3063_v61, %v2388_v26  ;;  %v999_v29 = vadd.f32 1.0, %v935_v54  ;;  %v869_v9 = vmul.bf16 1069105081, %v780_v51  ;;  %v1281_v61 = vld [vmem:[#allocation2 + $0x58] sm:$0xff] }
 0x1f8   : > { %v1829_v50 = vpop.eup %1828  ;;  %1846 = vrcp.f32 %v998_v48  ;;  %v749_v25 = vpack.c.bf16 %v2865_v49, %v2861_v44  ;;  %v875_v26 = vmul.bf16 1069105081, %v782_v57  ;;  %v1198_v16 = vmul.f32 %v2465_v28, %v1112_v42 }
 0x1f9   : > { %v1831_v41 = vpop.eup %1830  ;;  %v1114_v14 = vmul.f32 %v1829_v50, %v2720_v37  ;;  %1848 = vrcp.f32 %v993_v59  ;;  %v751_v39 = vpack.c.bf16 %v2869_v17, %v2857_v35  ;;  %v1202_v3 = vmul.f32 %v2465_v28, %v1116_v45 }
 0x1fa   : > { %v1833_v30 = vpop.eup %1832  ;;  %v1118_v52 = vmul.f32 %v1831_v41, %v2746_v4  ;;  %1850 = vrcp.f32 %v997_v27  ;;  %v781_v32 = vsub.bf16 0, %v749_v25 }
 0x1fb   : > { %v1835_v0 = vpop.eup %1834  ;;  %v1113_v21 = vmul.f32 %v1833_v30, %v2726_v31  ;;  %1852 = vrcp.f32 %v995_v8  ;;  %v783_v38 = vsub.bf16 0, %v751_v39  ;;  %v1200_v45 = vmul.f32 %v2472_v40, %v1114_v14 }
 0x1fc   : > { %v1837_v37 = vpop.eup %1836  ;;  %v1117_v63 = vmul.f32 %v1835_v0, %v2765_v43  ;;  %1854 = vrcp.f32 %v999_v29  ;;  %v872_v62 = vmul.bf16 1069105081, %v781_v32  ;;  %v1204_v19 = vmul.f32 %v2472_v40, %v1118_v52 }
 0x1fd   : > { %v1839_v12 = vpop.eup %1838  ;;  %v1199_v51 = vmul.f32 %v2497_v55, %v1113_v21  ;;  %v1115_v4 = vmul.f32 %v1837_v37, %v2734_v56  ;;  %1856 = vpow.bf16 %v869_v9  ;;  %v878_v10 = vmul.bf16 1069105081, %v783_v38 }
 0x1fe   : > { %v1203_v42 = vmul.f32 %v2497_v55, %v1117_v63  ;;  %v1119_v31 = vmul.f32 %v1839_v12, %v2773_v58  ;;  %1858 = vpow.bf16 %v875_v26 }
 0x1ff   : > { %v1841_v15 = vpop.eup %1840  ;;  %v1232_v24 = vadd.f32 %v1199_v51, %v1198_v16  ;;  %1860 = vpow.bf16 %v872_v62  ;;  %v1201_v23 = vmul.f32 %v2505_v60, %v1115_v4 }
 0x200   : > { %v1843_v43 = vpop.eup %1842  ;;  %v1233_v48 = vadd.f32 %v1203_v42, %v1202_v3  ;;  %v1120_v33 = vmul.f32 %v1841_v15, %v2777_v18  ;;  %1862 = vpow.bf16 %v878_v10  ;;  %v1205_v20 = vmul.f32 %v2505_v60, %v1119_v31  ;;  %v1282_v31 = vld [vmem:[#allocation2 + $0x60] sm:$0xff] }
 0x201   : > { %v1845_v56 = vpop.eup %1844  ;;  %v1248_v59 = vadd.f32 %v1232_v24, %v1200_v45  ;;  %v1124_v58 = vmul.f32 %v1843_v43, %v2795_v53  ;;  %v1283_v43 = vld [vmem:[#allocation2 + $0x68] sm:$0xff] }
 0x202   : > { %v1847_v54 = vpop.eup %1846  ;;  %v1249_v27 = vadd.f32 %v1233_v48, %v1204_v19  ;;  %v1122_v57 = vmul.f32 %v1845_v56, %v2781_v36  ;;  %v1206_v9 = vmul.f32 %v2465_v28, %v1120_v33 }
 0x203   : > { %v1849_v8 = vpop.eup %1848  ;;  %v1264_v22 = vadd.f32 %v1248_v59, %v1201_v23  ;;  %v1126_v50 = vmul.f32 %v1847_v54, %v2799_v1  ;;  %v1210_v25 = vmul.f32 %v2465_v28, %v1124_v58 }
 0x204   : > { %v1851_v18 = vpop.eup %1850  ;;  %v1265_v29 = vadd.f32 %v1249_v27, %v1205_v20  ;;  %v1121_v41 = vmul.f32 %v1849_v8, %v2785_v47  ;;  %v1208_v47 = vmul.f32 %v2472_v40, %v1122_v57 }
 0x205   : > { %v1853_v14 = vpop.eup %1852  ;;  %v1296_v53 = vadd.f32 %v1280_v13, %v1264_v22  ;;  %v1125_v39 = vmul.f32 %v1851_v18, %v2803_v2  ;;  %v1212_v21 = vmul.f32 %v2472_v40, %v1126_v50 }
 0x206   : > { %v1855_v30 = vpop.eup %1854  ;;  %v1297_v52 = vadd.f32 %v1281_v61, %v1265_v29  ;;  %v1207_v36 = vmul.f32 %v2497_v55, %v1121_v41  ;;  %v1123_v26 = vmul.f32 %v1853_v14, %v2791_v7 }
 0x207   : > { %1312 = vst [vmem:[#allocation2 + $0x50] sm:$0xff] %v1296_v53  ;;  %v1211_v1 = vmul.f32 %v2497_v55, %v1125_v39  ;;  %v1127_v0 = vmul.f32 %v1855_v30, %v2807_v46 }
 0x208   : > { %v1857_v16 = vpop.eup %1856  ;;  %1313 = vst [vmem:[#allocation2 + $0x58] sm:$0xff] %v1297_v52  ;;  %v1234_v32 = vadd.f32 %v1207_v36, %v1206_v9  ;;  %v1209_v3 = vmul.f32 %v2505_v60, %v1123_v26 }
 0x209   : > { %v1859_v37 = vpop.eup %1858  ;;  %v1235_v2 = vadd.f32 %v1211_v1, %v1210_v25  ;;  %v936_v63 = vunpack.c.l.bf16 %v1857_v16  ;;  %v940_v38 = vunpack.c.h.bf16 %v1857_v16  ;;  %v1213_v7 = vmul.f32 %v2505_v60, %v1127_v0 }
 0x20a   : > { %v1861_v12 = vpop.eup %1860  ;;  %v1250_v51 = vadd.f32 %v1234_v32, %v1208_v47  ;;  %v938_v4 = vunpack.c.l.bf16 %v1859_v37  ;;  %v942_v62 = vunpack.c.h.bf16 %v1859_v37  ;;  %v1284_v32 = vld [vmem:[#allocation2 + $0x70] sm:$0xff] }
 0x20b   : > { %v1863_v46 = vpop.eup %1862  ;;  %v1251_v42 = vadd.f32 %v1235_v2, %v1212_v21  ;;  %v1000_v10 = vadd.f32 1.0, %v936_v63  ;;  %v1004_v15 = vadd.f32 1.0, %v940_v38  ;;  %v937_v45 = vunpack.c.l.bf16 %v1861_v12  ;;  %v1285_v2 = vld [vmem:[#allocation2 + $0x78] sm:$0xff]  ;;  %v1323_v38 = vld [vmem:[#allocation2 + $0x8] sm:$0xff] (!%p1568_p1) }
 0x20c   : > { %v1266_v24 = vadd.f32 %v1250_v51, %v1209_v3  ;;  %v1002_v19 = vadd.f32 1.0, %v938_v4  ;;  %v1006_v48 = vadd.f32 1.0, %v942_v62  ;;  %v941_v33 = vunpack.c.h.bf16 %v1861_v12  ;;  %v1325_v63 = vld [vmem:[#allocation2 + $0x18] sm:$0xff] (!%p1568_p1)  ;;  %v1326_v12 = vld [vmem:[#allocation2 + $0x20] sm:$0xff] (!%p1568_p1)  ;;  %v1328_v51 = vld [vmem:[#allocation2 + $0x30] sm:$0xff] (!%p1568_p1) }
 0x20d   : > { %v1267_v56 = vadd.f32 %v1251_v42, %v1213_v7  ;;  %1864 = vrcp.f32 %v1000_v10  ;;  %v1001_v23 = vadd.f32 1.0, %v937_v45  ;;  %v939_v59 = vunpack.c.l.bf16 %v1863_v46  ;;  %v1329_v7 = vld [vmem:[#allocation2 + $0x38] sm:$0xff] (!%p1568_p1)  ;;  %v1331_v4 = vld [vmem:[#allocation2 + $0x48] sm:$0xff] (!%p1568_p1)  ;;  %v1330_v62 = vld [vmem:[#allocation2 + $0x40] sm:$0xff] (!%p1568_p1) }
 0x20e   : > { %v1298_v58 = vadd.f32 %v1282_v31, %v1266_v24  ;;  %1866 = vrcp.f32 %v1004_v15  ;;  %v1005_v54 = vadd.f32 1.0, %v941_v33  ;;  %v943_v20 = vunpack.c.h.bf16 %v1863_v46  ;;  %v1332_v42 = vld [vmem:[#allocation2 + $0x50] sm:$0xff] (!%p1568_p1) }
 0x20f   : > { %v1299_v27 = vadd.f32 %v1283_v43, %v1267_v56  ;;  %1868 = vrcp.f32 %v1002_v19  ;;  %v1003_v13 = vadd.f32 1.0, %v939_v59  ;;  %v1333_v46 = vld [vmem:[#allocation2 + $0x58] sm:$0xff] (!%p1568_p1) }
 0x210   : > { %1314 = vst [vmem:[#allocation2 + $0x60] sm:$0xff] %v1298_v58  ;;  %1870 = vrcp.f32 %v1006_v48  ;;  %v1007_v57 = vadd.f32 1.0, %v943_v20 }
 0x211   : > { %1315 = vst [vmem:[#allocation2 + $0x68] sm:$0xff] %v1299_v27  ;;  %1872 = vrcp.f32 %v1001_v23 }
 0x212   : > { %1874 = vrcp.f32 %v1005_v54 }
 0x213   : > { %1876 = vrcp.f32 %v1003_v13 }
 0x214   : > { %1878 = vrcp.f32 %v1007_v57 }
 0x217   : > { %v1865_v8 = vpop.eup %1864  ;;  %v1334_v10 = vld [vmem:[#allocation2 + $0x60] sm:$0xff] (!%p1568_p1) }
 0x218   : > { %v1867_v22 = vpop.eup %1866  ;;  %v1128_v61 = vmul.f32 %v1865_v8, %v2828_v5  ;;  %v1335_v31 = vld [vmem:[#allocation2 + $0x68] sm:$0xff] (!%p1568_p1) }
 0x219   : > { %v1869_v50 = vpop.eup %1868  ;;  %v1132_v18 = vmul.f32 %v1867_v22, %v2842_v11 }
 0x21a   : > { %v1871_v29 = vpop.eup %1870  ;;  %v1130_v9 = vmul.f32 %v1869_v50, %v2837_v6  ;;  %v1214_v25 = vmul.f32 %v2465_v28, %v1128_v61 }
 0x21b   : > { %v1873_v41 = vpop.eup %1872  ;;  %v1134_v14 = vmul.f32 %v1871_v29, %v2846_v34  ;;  %v1218_v52 = vmul.f32 %v2465_v28, %v1132_v18 }
 0x21c   : > { %v1875_v53 = vpop.eup %1874  ;;  %v1129_v39 = vmul.f32 %v1873_v41, %v2861_v44  ;;  %v1216_v34 = vmul.f32 %v2472_v40, %v1130_v9 }
 0x21d   : > { %v1877_v30 = vpop.eup %1876  ;;  %v1133_v36 = vmul.f32 %v1875_v53, %v2865_v49  ;;  %v1220_v16 = vmul.f32 %v2472_v40, %v1134_v14  ;;  %v1322_v40 = vld [vmem:[#allocation2] sm:$0xff] (!%p1568_p1) }
 0x21e   : > { %v1879_v5 = vpop.eup %1878  ;;  %v1215_v26 = vmul.f32 %v2497_v55, %v1129_v39  ;;  %v1131_v11 = vmul.f32 %v1877_v30, %v2857_v35  ;;  %1338 = vadd.xlane.f32.xlu0 (!%p1568_p1), %v1322_v40 }
 0x21f   : > { %v1219_v6 = vmul.f32 %v2497_v55, %v1133_v36  ;;  %v1135_v1 = vmul.f32 %v1879_v5, %v2869_v17  ;;  %v1324_v17 = vld [vmem:[#allocation2 + $0x10] sm:$0xff] (!%p1568_p1) }
 0x220   : > { %v1236_v0 = vadd.f32 %v1215_v26, %v1214_v25  ;;  %v1217_v47 = vmul.f32 %v2505_v60, %v1131_v11  ;;  %1342 = vadd.xlane.f32.xlu1 (!%p1568_p1), %v1324_v17 }
 0x221   : > { %v1237_v44 = vadd.f32 %v1219_v6, %v1218_v52  ;;  %v1221_v49 = vmul.f32 %v2505_v60, %v1135_v1  ;;  %v1327_v60 = vld [vmem:[#allocation2 + $0x28] sm:$0xff] (!%p1568_p1) }
 0x222   : > { %v1252_v28 = vadd.f32 %v1236_v0, %v1216_v34  ;;  %1340 = vadd.xlane.f32.xlu0 (!%p1568_p1), %v1323_v38 }
 0x223   : > { %v1253_v21 = vadd.f32 %v1237_v44, %v1220_v16  ;;  %1321 = sbr.rel (%p1568_p1) target bundleno = 715 (0x2cb), region = 60 }
 0x224   : > { %v1268_v37 = vadd.f32 %v1252_v28, %v1217_v47  ;;  %1344 = vadd.xlane.f32.xlu1 (!%p1568_p1), %v1325_v63 }
 0x225   : > { %v1269_v35 = vadd.f32 %v1253_v21, %v1221_v49 }
 0x226   : > { %v1300_v3 = vadd.f32 %v1284_v32, %v1268_v37  ;;  %1346 = vadd.xlane.f32.xlu0 (!%p1568_p1), %v1326_v12 }
 0x227   : > { %v1301_v55 = vadd.f32 %v1285_v2, %v1269_v35 }
 0x228   : > { %1316 = vst [vmem:[#allocation2 + $0x70] sm:$0xff] %v1300_v3  ;;  %1348 = vadd.xlane.f32.xlu1 (!%p1568_p1), %v1327_v60 }
 0x229   : > { %1317 = vst [vmem:[#allocation2 + $0x78] sm:$0xff] %v1301_v55 }
 0x22a   : > { %1350 = vadd.xlane.f32.xlu0 %v1328_v51 }
 0x22c   : > { %1352 = vadd.xlane.f32.xlu1 %v1329_v7 }
 0x22e   : > { %1354 = vadd.xlane.f32.xlu0 %v1330_v62 }
 0x22f   : > { %v1336_v45 = vld [vmem:[#allocation2 + $0x70] sm:$0xff] }
 0x230   : > { %1356 = vadd.xlane.f32.xlu1 %v1331_v4  ;;  %v1337_v15 = vld [vmem:[#allocation2 + $0x78] sm:$0xff] }
 0x232   : > { %1358 = vadd.xlane.f32.xlu0 %v1332_v42 }
 0x234   : > { %1360 = vadd.xlane.f32.xlu1 %v1333_v46 }
 0x236   : > { %1362 = vadd.xlane.f32.xlu0 %v1334_v10 }
 0x238   : > { %1364 = vadd.xlane.f32.xlu1 %v1335_v31 }
 0x23a   : > { %1366 = vadd.xlane.f32.xlu0 %v1336_v45 }
 0x23c   : > { %1368 = vadd.xlane.f32.xlu1 %v1337_v15 }
 0x2ab   : > { %v1339_v43 = vpop.xlane.xlu0 %1338 }
 0x2ac   : > { %1371 = vst.msk [vmem:[#allocation11] sm:$0xff] %vm1370_vm1, %v1339_v43 }
 0x2ad   : > { %v1343_v24 = vpop.xlane.xlu1 %1342 }
 0x2ae   : > { %1373 = vst.msk [vmem:[#allocation11 + $0x10] sm:$0xff] %vm1370_vm1, %v1343_v24 }
 0x2af   : > { %v1341_v48 = vpop.xlane.xlu0 %1340 }
 0x2b0   : > { %1372 = vst.msk [vmem:[#allocation11 + $0x8] sm:$0xff] %vm1370_vm1, %v1341_v48 }
 0x2b1   : > { %v1345_v19 = vpop.xlane.xlu1 %1344 }
 0x2b2   : > { %1374 = vst.msk [vmem:[#allocation11 + $0x18] sm:$0xff] %vm1370_vm1, %v1345_v19 }
 0x2b3   : > { %v1347_v56 = vpop.xlane.xlu0 %1346 }
 0x2b4   : > { %1375 = vst.msk [vmem:[#allocation11 + $0x20] sm:$0xff] %vm1370_vm1, %v1347_v56 }
 0x2b5   : > { %v1349_v33 = vpop.xlane.xlu1 %1348 }
 0x2b6   : > { %1376 = vst.msk [vmem:[#allocation11 + $0x28] sm:$0xff] %vm1370_vm1, %v1349_v33 }
 0x2b7   : > { %v1351_v59 = vpop.xlane.xlu0 %1350 }
 0x2b8   : > { %1377 = vst.msk [vmem:[#allocation11 + $0x30] sm:$0xff] %vm1370_vm1, %v1351_v59 }
 0x2b9   : > { %v1353_v23 = vpop.xlane.xlu1 %1352 }
 0x2ba   : > { %1378 = vst.msk [vmem:[#allocation11 + $0x38] sm:$0xff] %vm1370_vm1, %v1353_v23 }
 0x2bb   : > { %v1355_v54 = vpop.xlane.xlu0 %1354 }
 0x2bc   : > { %1379 = vst.msk [vmem:[#allocation11 + $0x40] sm:$0xff] %vm1370_vm1, %v1355_v54 }
 0x2bd   : > { %v1357_v58 = vpop.xlane.xlu1 %1356 }
 0x2be   : > { %1380 = vst.msk [vmem:[#allocation11 + $0x48] sm:$0xff] %vm1370_vm1, %v1357_v58 }
 0x2bf   : > { %v1359_v27 = vpop.xlane.xlu0 %1358 }
 0x2c0   : > { %1381 = vst.msk [vmem:[#allocation11 + $0x50] sm:$0xff] %vm1370_vm1, %v1359_v27 }
 0x2c1   : > { %v1361_v20 = vpop.xlane.xlu1 %1360 }
 0x2c2   : > { %1382 = vst.msk [vmem:[#allocation11 + $0x58] sm:$0xff] %vm1370_vm1, %v1361_v20 }
 0x2c3   : > { %v1363_v57 = vpop.xlane.xlu0 %1362 }
 0x2c4   : > { %1383 = vst.msk [vmem:[#allocation11 + $0x60] sm:$0xff] %vm1370_vm1, %v1363_v57 }
 0x2c5   : > { %v1365_v13 = vpop.xlane.xlu1 %1364 }
 0x2c6   : > { %1384 = vst.msk [vmem:[#allocation11 + $0x68] sm:$0xff] %vm1370_vm1, %v1365_v13 }
 0x2c7   : > { %v1367_v22 = vpop.xlane.xlu0 %1366 }
 0x2c8   : > { %1385 = vst.msk [vmem:[#allocation11 + $0x70] sm:$0xff] %vm1370_vm1, %v1367_v22 }
 0x2c9   : > { %v1369_v8 = vpop.xlane.xlu1 %1368 }
 0x2ca   : > { %1386 = vst.msk [vmem:[#allocation11 + $0x78] sm:$0xff] %vm1370_vm1, %v1369_v8 }
 0x2cb PF: > { %p1607_p4 = scmp.eq.s32.totalorder %s2218_s12, 4  ;;  %s2099_s18 = smov [#allocation11]  }
 0x2cc   : > { %s1396_s13 = sshll.u32 %s2099_s18, 4  ;;  %s1397_s13 = int_to_ptr.vmem [resolvable:$true] %s1396_s13 }
 0x2cd   : > { %s1998_s29 = scalar_lea.vmem %s1397_s13, 2048  ;;  %p2005_p13 = scmp.lt.s32.totalorder %s1397_s13, %s1397_s13 }
 0x2ce   : > { %p1999_p7 = scmp.ne.s32.totalorder %s1397_s13, %s1998_s29  ;;  %p2006_p3 = scmp.lt.s32.totalorder %s1998_s29, %s1998_s29 }
 0x2d0   : > { %p2000_p2 = pnand %p1999_p7, %p1607_p4  ;;  %p2007_p10 = por %p2006_p3, %p2005_p13 }
 0x2d2   : > { %p2001_p8 = pneg %p2000_p2 }
 0x2d4   : > { %p2008_p12 = pnand %p2007_p10, %p2001_p8 }
 0x2d6   : > { %2011 = shalt.err (!%p2008_p12)
}
 0x2d7   : > { %s2012_s30 = scalar_lea.hbm %s2983_s4, 2048 }
 0x2d8   : > { %p2013_p11 = scmp.ne.s32.totalorder %s2983_s4, %s2012_s30  ;;  %p2018_p6 = scmp.lt.u32.totalorder %s2012_s30, %s2983_s4 }
 0x2da   : > { %p2014_p5 = pnand %p2013_p11, %p1607_p4 }
 0x2dc   : > { %p2015_p9 = pneg %p2014_p5 }
 0x2de   : > { %p2020_p0 = pnand %p2018_p6, %p2015_p9 }
 0x2e0   : > { %2023 = shalt.err (!%p2020_p0)
}
 0x2e1   : > { %s2100_s22 = smov 128   ;;  %s2101_s21 = smov 8  }
 0x2e2   : > { %1587 = dma.vmem_to_hbm [thread:$0]  (%p1607_p4), %s1397_s13, 2048, %s2983_s4, [#allocation5], %s2100_s22, %s2100_s22, %s2101_s21  }
 0x2e3   : > { %2061 = dma.done.wait (%p1607_p4), [#allocation5], 2048  }
 0x2e4   : > { %2063 = vsyncadd (%p1607_p4), [#allocation5], 4294965248 }
 0x2e5 PF: > { %s22_s20 = sadd.s32 1, %s2086_s20   ;;  %s3064_s5 = sld [smem:[#allocation16_spill]] }
 0x2e6   : > { %p19_p1 = scmp.ge.s32.totalorder %s22_s20, 7   ;;  %s3065_s15 = smov %s2070_s16 }
 0x2e7   : > { %s3066_s16 = smov %s2074_s17  ;;  %s3067_s17 = smov %s2173_s27 }
 0x2e8   : > { %s3068_s18 = smov %s2082_s19  ;;  %21 = sbr.rel (!%p19_p1) target bundleno = 10 (0xa), region = 112 }
 0x2eb   : > { %s3069_s19 = smov %s3064_s5 }
 0x2ef   :  { %1412 = vsyncpa [#allocation4], 1 }
 0x2f0   :  { %1414 = vsyncpa [#allocation4 + $0x1], 1 }
 0x2f1   :  { %1415 = vsyncpa [#allocation7], 1 }
 0x2f2   :  { %1417 = vsyncpa [#allocation7 + $0x1], 1 }
 0x2f3   :  { %1418 = vsyncpa [#allocation10], 1 }
 0x2f4   :  { %1420 = vsyncpa [#allocation10 + $0x1], 1 }
 0x2f5   :  { %1421 = vsyncpa [#allocation5], 1 }
 0x2f6   :  { %1423 = vsyncpa [#allocation5 + $0x1], 1 }

</bundles_post_ra>
